<compile_context>
chip_gen: v6e
topology: v6e:2x2x1
jax: 0.10.0
libtpu: 0.0.40
codegen_flags: <defaults>
</compile_context>

<pallas_src>
import math
import jax
import jax.numpy as jnp
from jax.experimental import pallas as pl
from jax.experimental.pallas import tpu as pltpu


def _round_up(x, m):
    return (x + m - 1) // m * m


def _pos2weight_kernel(x_ref, w1_ref, b1_ref, w2_ref, b2_ref, o_ref):
    x = x_ref[...]                       # (tm, 3)  f32
    w1 = w1_ref[...]                     # (3, 256) f32

    # Layer 1 on the VPU: contraction depth is only 3, so three broadcast
    # FMAs over a (tm, 256) tile beat a full MXU column pass.
    h = b1_ref[...]                      # (1, 256) -> broadcasts over rows
    h = h + x[:, 0:1] * w1[0:1, :]
    h = h + x[:, 1:2] * w1[1:2, :]
    h = h + x[:, 2:3] * w1[2:3, :]
    h = jnp.maximum(h, 0.0)              # ReLU (VPU)

    # Layer 2 on the MXU: bf16 operands, f32 accumulation.
    out = jnp.dot(h.astype(w2_ref.dtype), w2_ref[...],
                  preferred_element_type=jnp.float32)
    o_ref[...] = (out + b2_ref[...]).astype(o_ref.dtype)


def pos2weight(x, w1, b1, w2, b2, *, tm=1024, tn=512,
               matmul_dtype=jnp.bfloat16):
    """x: (N, 3) f32.  Returns (N, K) with K = kernel_size^2 * inC * outC."""
    N, in_feat = x.shape
    hidden = w1.shape[1]
    K = w2.shape[1]
    assert in_feat == 3, "Pos2Weight takes 3 input features"
    assert w1.shape[0] == in_feat and w2.shape[0] == hidden
    assert b1.shape == (hidden,) and b2.shape == (K,)

    # --- Pad K to a multiple of 128 so output stores are lane-dense. ---
    K_pad = _round_up(K, 128)
    if K_pad != K:
        w2 = jnp.pad(w2, ((0, 0), (0, K_pad - K)))
        b2 = jnp.pad(b2, ((0, K_pad - K),))

    # --- Column tile: multiple of 128 that divides K_pad. ---
    tn = max(128, min(_round_up(tn, 128), K_pad))
    tn = math.gcd(K_pad, tn)

    # --- Row tile: multiple of 8, clamped to the (padded) problem size. ---
    tm = max(8, min(_round_up(tm, 8), _round_up(N, 8)))
    N_pad = _round_up(N, tm)
    x_p = x if N_pad == N else jnp.pad(x, ((0, N_pad - N), (0, 0)))

    w1_f = w1.astype(jnp.float32)
    b1_2d = b1.reshape(1, hidden).astype(jnp.float32)
    w2_c = w2.astype(matmul_dtype)
    b2_2d = b2.reshape(1, K_pad).astype(jnp.float32)

    grid = (N_pad // tm, K_pad // tn)

    # --- VMEM budget: double-buffered tiles + intermediates, capped at
    #     48 MiB to leave headroom under v7x's 64 MiB physical VMEM. ---
    dsz = jnp.dtype(matmul_dtype).itemsize
    est = (2 * tm * 128 * 4              # x tile (lane-padded)
           + 2 * hidden * tn * dsz       # w2 tile
           + 2 * tm * tn * 4             # out tile
           + tm * hidden * (4 + dsz)     # h (f32 + bf16 copy)
           + 4 * 8 * max(hidden, tn) * 4)  # w1 / biases
    vmem_limit = int(min(max(2 * est + (4 << 20), 32 << 20), 48 << 20))

    out = pl.pallas_call(
        _pos2weight_kernel,
        out_shape=jax.ShapeDtypeStruct((N_pad, K_pad), x.dtype),
        grid_spec=pltpu.PrefetchScalarGridSpec(
            num_scalar_prefetch=0,
            grid=grid,
            in_specs=[
                # x tile: (tm, 3) — last dim equals full array dim, OK.
                pl.BlockSpec((tm, in_feat), lambda i, j: (i, 0)),
                # w1/b1: tiny, resident every grid step.
                pl.BlockSpec((in_feat, hidden), lambda i, j: (0, 0)),
                pl.BlockSpec((1, hidden), lambda i, j: (0, 0)),
                # w2/b2: tiled along K so VMEM stays flat as K grows.
                pl.BlockSpec((hidden, tn), lambda i, j: (0, j)),
                pl.BlockSpec((1, tn), lambda i, j: (0, j)),
            ],
            out_specs=pl.BlockSpec((tm, tn), lambda i, j: (i, j)),
        ),
        compiler_params=pltpu.CompilerParams(
            dimension_semantics=("parallel", "parallel"),
            vmem_limit_bytes=vmem_limit,
        ),
    )(x_p, w1_f, b1_2d, w2_c, b2_2d)

    return out[:N, :K]


def init_pos2weight_params(key, inC, kernel_size=3, outC=3, dtype=jnp.float32):
    """Deterministic init mimicking torch.nn.Linear default U[-1/sqrt(fan_in), 1/sqrt(fan_in)]."""
    hidden = 256
    K = kernel_size * kernel_size * inC * outC
    k1, k2, k3, k4 = jax.random.split(key, 4)
    bound1 = 1.0 / math.sqrt(3)
    bound2 = 1.0 / math.sqrt(hidden)
    w1 = jax.random.uniform(k1, (3, hidden), dtype, minval=-bound1, maxval=bound1)
    b1 = jax.random.uniform(k2, (hidden,), dtype, minval=-bound1, maxval=bound1)
    w2 = jax.random.uniform(k3, (hidden, K), dtype, minval=-bound2, maxval=bound2)
    b2 = jax.random.uniform(k4, (K,), dtype, minval=-bound2, maxval=bound2)
    return w1, b1, w2, b2


def pos2weight_ref(x, w1, b1, w2, b2):
    h = jnp.maximum(x @ w1 + b1, 0.0)
    return h @ w2 + b2


if __name__ == "__main__":
    key = jax.random.PRNGKey(0)
    kx, kp = jax.random.split(key)

    inC, kernel_size, outC = 4, 3, 3          # K = 9 * 4 * 3 = 108 (padded to 128)
    N = 256                                   # number of position samples

    x = jax.random.uniform(kx, (N, 3), jnp.float32)
    w1, b1, w2, b2 = init_pos2weight_params(kp, inC, kernel_size, outC)

    out = jax.block_until_ready(pos2weight(x, w1, b1, w2, b2))

    ref = pos2weight_ref(x, w1, b1, w2, b2)
    assert out.shape == (N, kernel_size * kernel_size * inC * outC)
    # bf16 operands (f32 accumulation) in layer 2 -> relaxed tolerance vs f32 ref.
    assert jnp.allclose(out, ref, atol=5e-2, rtol=5e-2), "mismatch vs reference"

    print("KERNEL_OK")
</pallas_src>

<mosaic_0001>
module attributes {stable_mosaic.version = 11 : i64} {
  func.func @_pos2weight_kernel(%arg0: i32, %arg1: i32, %arg2: memref<256x3xf32, #tpu.memory_space<vmem>>, %arg3: memref<3x256xf32, #tpu.memory_space<vmem>>, %arg4: memref<1x256xf32, #tpu.memory_space<vmem>>, %arg5: memref<256x128xbf16, #tpu.memory_space<vmem>>, %arg6: memref<1x128xf32, #tpu.memory_space<vmem>>, %arg7: memref<256x128xf32, #tpu.memory_space<vmem>>) attributes {dimension_semantics = [#tpu.dimension_semantics<parallel>, #tpu.dimension_semantics<parallel>], iteration_bounds = array<i64: 1, 1>, scalar_prefetch = 0 : i64, scratch_operands = 0 : i64, tpu.core_type = #tpu.core_type<tc>, window_params = [{transform_indices = @transform_0, window_bounds = array<i64: 256, 3>}, {pipeline_mode = #tpu.pipeline_mode<synchronous>, transform_indices = @transform_1, window_bounds = array<i64: 3, 256>}, {pipeline_mode = #tpu.pipeline_mode<synchronous>, transform_indices = @transform_2, window_bounds = array<i64: 1, 256>}, {transform_indices = @transform_3, window_bounds = array<i64: 256, 128>}, {transform_indices = @transform_4, window_bounds = array<i64: 1, 128>}, {transform_indices = @transform_5, window_bounds = array<i64: 256, 128>}]} {
    %c0 = arith.constant 0 : index
    %c0_0 = arith.constant 0 : index
    %0 = vector.load %arg2[%c0, %c0_0] : memref<256x3xf32, #tpu.memory_space<vmem>>, vector<256x3xf32>
    %c0_1 = arith.constant 0 : index
    %c0_2 = arith.constant 0 : index
    %1 = vector.load %arg3[%c0_1, %c0_2] : memref<3x256xf32, #tpu.memory_space<vmem>>, vector<3x256xf32>
    %c0_3 = arith.constant 0 : index
    %c0_4 = arith.constant 0 : index
    %2 = vector.load %arg4[%c0_3, %c0_4] : memref<1x256xf32, #tpu.memory_space<vmem>>, vector<1x256xf32>
    %3 = vector.extract_strided_slice %0 {offsets = [0, 0], sizes = [256, 1], strides = [1, 1]} : vector<256x3xf32> to vector<256x1xf32>
    %4 = vector.extract_strided_slice %1 {offsets = [0, 0], sizes = [1, 256], strides = [1, 1]} : vector<3x256xf32> to vector<1x256xf32>
    %5 = vector.broadcast %3 : vector<256x1xf32> to vector<256x256xf32>
    %6 = vector.broadcast %4 : vector<1x256xf32> to vector<256x256xf32>
    %7 = arith.mulf %5, %6 : vector<256x256xf32>
    %8 = vector.broadcast %2 : vector<1x256xf32> to vector<256x256xf32>
    %9 = arith.addf %8, %7 : vector<256x256xf32>
    %10 = vector.extract_strided_slice %0 {offsets = [0, 1], sizes = [256, 1], strides = [1, 1]} : vector<256x3xf32> to vector<256x1xf32>
    %11 = vector.extract_strided_slice %1 {offsets = [1, 0], sizes = [1, 256], strides = [1, 1]} : vector<3x256xf32> to vector<1x256xf32>
    %12 = vector.broadcast %10 : vector<256x1xf32> to vector<256x256xf32>
    %13 = vector.broadcast %11 : vector<1x256xf32> to vector<256x256xf32>
    %14 = arith.mulf %12, %13 : vector<256x256xf32>
    %15 = arith.addf %9, %14 : vector<256x256xf32>
    %16 = vector.extract_strided_slice %0 {offsets = [0, 2], sizes = [256, 1], strides = [1, 1]} : vector<256x3xf32> to vector<256x1xf32>
    %17 = vector.extract_strided_slice %1 {offsets = [2, 0], sizes = [1, 256], strides = [1, 1]} : vector<3x256xf32> to vector<1x256xf32>
    %18 = vector.broadcast %16 : vector<256x1xf32> to vector<256x256xf32>
    %19 = vector.broadcast %17 : vector<1x256xf32> to vector<256x256xf32>
    %20 = arith.mulf %18, %19 : vector<256x256xf32>
    %21 = arith.addf %15, %20 : vector<256x256xf32>
    %cst = arith.constant 0.000000e+00 : f32
    %22 = vector.broadcast %cst : f32 to vector<256x256xf32>
    %23 = arith.maximumf %21, %22 : vector<256x256xf32>
    %24 = arith.truncf %23 : vector<256x256xf32> to vector<256x256xbf16>
    %c0_5 = arith.constant 0 : index
    %c0_6 = arith.constant 0 : index
    %25 = vector.load %arg5[%c0_5, %c0_6] : memref<256x128xbf16, #tpu.memory_space<vmem>>, vector<256x128xbf16>
    %cst_7 = arith.constant dense<0.000000e+00> : vector<256x128xf32>
    %26 = tpu.matmul %24, %25, %cst_7 {dimension_numbers = #tpu.dot_dimension_numbers<[1], [0], [0], [1], [0, 0, 1, 1], [], []>} : vector<256x256xbf16>, vector<256x128xbf16>, vector<256x128xf32> -> vector<256x128xf32>
    %c0_8 = arith.constant 0 : index
    %c0_9 = arith.constant 0 : index
    %27 = vector.load %arg6[%c0_8, %c0_9] : memref<1x128xf32, #tpu.memory_space<vmem>>, vector<1x128xf32>
    %28 = vector.broadcast %27 : vector<1x128xf32> to vector<256x128xf32>
    %29 = arith.addf %26, %28 : vector<256x128xf32>
    %c0_10 = arith.constant 0 : index
    %c0_11 = arith.constant 0 : index
    %30 = vector.load %arg7[%c0_10, %c0_11] : memref<256x128xf32, #tpu.memory_space<vmem>>, vector<256x128xf32>
    tpu.vector_store %arg7[%c0_10, %c0_11], %29 {strides = array<i32>} : memref<256x128xf32, #tpu.memory_space<vmem>>, vector<256x128xf32>,
    return
  }
  func.func @transform_0(%arg0: i32, %arg1: i32) -> (i32, i32) {
    %c0_i32 = arith.constant 0 : i32
    %c0_i32_0 = arith.constant 0 : i32
    return %arg0, %c0_i32 : i32, i32
  }
  func.func @transform_1(%arg0: i32, %arg1: i32) -> (i32, i32) {
    %c0_i32 = arith.constant 0 : i32
    %c0_i32_0 = arith.constant 0 : i32
    %c0_i32_1 = arith.constant 0 : i32
    return %c0_i32, %c0_i32_0 : i32, i32
  }
  func.func @transform_2(%arg0: i32, %arg1: i32) -> (i32, i32) {
    %c0_i32 = arith.constant 0 : i32
    %c0_i32_0 = arith.constant 0 : i32
    %c0_i32_1 = arith.constant 0 : i32
    return %c0_i32, %c0_i32_0 : i32, i32
  }
  func.func @transform_3(%arg0: i32, %arg1: i32) -> (i32, i32) {
    %c0_i32 = arith.constant 0 : i32
    %c0_i32_0 = arith.constant 0 : i32
    return %c0_i32, %arg1 : i32, i32
  }
  func.func @transform_4(%arg0: i32, %arg1: i32) -> (i32, i32) {
    %c0_i32 = arith.constant 0 : i32
    %c0_i32_0 = arith.constant 0 : i32
    return %c0_i32, %arg1 : i32, i32
  }
  func.func @transform_5(%arg0: i32, %arg1: i32) -> (i32, i32) {
    %c0_i32 = arith.constant 0 : i32
    return %arg0, %arg1 : i32, i32
  }
}

</mosaic_0001>

<bundles_post_ra>
// kernel: tpu_custom_call.1
= control target key start
LH: loop header
LB: loop body
LE: loop exit
PB: predicated region body
PF: predicated region fallthrough
CT: control target
= control target key end

     0   :  { %v2412_v2 = vmov 1   ;;  %v2414_v3 = vmov 0   ;;  %v2410_v12 = vmov 2   ;;  %s2404_s0 = inlined_call_operand.vmem [shape: f32[256,3], index: 0, kind: input, shape index: {}]   ;;  %s2405_s1 = inlined_call_operand.vmem [shape: f32[3,256], index: 1, kind: input, shape index: {}]   ;;  %s2406_s2 = inlined_call_operand.vmem [shape: f32[1,256], index: 2, kind: input, shape index: {}]   ;;  %s2407_s3 = inlined_call_operand.vmem [shape: bf16[256,128], index: 3, kind: input, shape index: {}]   ;;  %s2408_s4 = inlined_call_operand.vmem [shape: f32[1,128], index: 4, kind: input, shape index: {}]   ;;  %s2409_s5 = inlined_call_operand.hbm [shape: f32[256,128], index: 5, kind: output, shape index: {}]  }
   0x1   :  { %v1619_v0 = vld [vmem:[%s2404_s0 + $0x10] sm:$0xff]  ;;  %v1624_v1 = vld [vmem:[%s2404_s0] sm:$0xff]  ;;  %1514 = vset.pattern.permute.xlu0 %v2412_v2  ;;  %1513 = vset.pattern.permute.xlu1 %v2414_v3  ;;  %v1633_v4 = vld [vmem:[%s2404_s0 + $0x18] sm:$0xff] }
   0x2   :  { %68 = vperm.xlu1 %1513, %v1619_v0   ;;  %375 = vperm.xlu0 %1514, %v1624_v1   ;;  %v39_v5 = vld [vmem:[%s2404_s0 + $0x88] sm:$0xff]  ;;  %v1647_v7 = vld [vmem:[%s2404_s0 + $0x38] sm:$0xff]  ;;  %v1652_v8 = vld [vmem:[%s2404_s0 + $0xa0] sm:$0xff] }
   0x3   :  { %v1642_v6 = vld [vmem:[%s2404_s0 + $0x28] sm:$0xff]  ;;  %v1671_v11 = vld [vmem:[%s2404_s0 + $0x58] sm:$0xff] }
   0x4   :  { %v1659_v9 = vld [vmem:[%s2404_s0 + $0x48] sm:$0xff] }
   0x5   :  { %v1666_v10 = vld [vmem:[%s2404_s0 + $0x8] sm:$0xff] }
   0x6   :  { %73 = vperm.xlu1 %1513, %v1633_v4   ;;  %443 = vperm.xlu0 %1514, %v39_v5  }
   0xa   :  { %83 = vperm.xlu1 %1513, %v1642_v6   ;;  %387 = vperm.xlu0 %1514, %v1633_v4  }
   0xe   :  { %93 = vperm.xlu1 %1513, %v1647_v7   ;;  %455 = vperm.xlu0 %1514, %v1652_v8  }
  0x12   :  { %103 = vperm.xlu1 %1513, %v1659_v9   ;;  %1522 = vset.pattern.permute.xlu0 %v2410_v12 }
  0x13   :  { %653 = vperm.xlu0 %1522, %v1666_v10  }
  0x14   :  { %10 = vsyncpa [#allocation3], 0  ;;  %v1681_v13 = vld [vmem:[%s2404_s0 + $0x98] sm:$0xff]  ;;  %v1690_v14 = vld [vmem:[%s2404_s0 + $0x80] sm:$0xff] }
  0x15   :  { %v1695_v15 = vld [vmem:[%s2404_s0 + $0x30] sm:$0xff]  ;;  %v1542_v16 = vld [vmem:[%s2407_s3 + $0x78] sm:$0xff]   ;;  %v1546_v21 = vld [vmem:[%s2407_s3 + $0x68] sm:$0xff]  }
  0x16   :  { %113 = vperm.xlu1 %1513, %v1671_v11   ;;  %v1705_v17 = vld [vmem:[%s2404_s0 + $0xb8] sm:$0xff]  ;;  %1379 = vmatprep.subr.bf16.mxu0 %v1542_v16  ;;  %v1544_v19 = vld [vmem:[%s2407_s3 + $0x70] sm:$0xff]   ;;  %v1547_v23 = vld [vmem:[%s2407_s3 + $0x28] sm:$0xff]  }
  0x17   :  { %657 = vperm.xlu0 %1522, %v1619_v0   ;;  %v1543_v18 = vld [vmem:[%s2407_s3 + $0x38] sm:$0xff]   ;;  %1491 = vmatprep.subr.bf16.mxu1 %v1542_v16  ;;  %v1545_v20 = vld [vmem:[%s2407_s3 + $0x30] sm:$0xff]   ;;  %v1548_v24 = vld [vmem:[%s2407_s3 + $0x60] sm:$0xff]  }
  0x18   :  { %1380 = vmatpush3.bf16.msra.mxu0 %v1543_v18  ;;  %1499 = vmatpush3.bf16.msra.mxu1 %v1543_v18  ;;  %v1727_v22 = vld [vmem:[%s2404_s0 + $0x50] sm:$0xff]  ;;  %v1739_v25 = vld [vmem:[%s2404_s0 + $0xd8] sm:$0xff]  ;;  %v1549_v26 = vld [vmem:[%s2407_s3 + $0x20] sm:$0xff]  }
  0x19   :  { %1381 = vmatprep.subr.bf16.mxu0 %v1544_v19  ;;  %1492 = vmatprep.subr.bf16.mxu1 %v1544_v19  ;;  %v1550_v27 = vld [vmem:[%s2407_s3 + $0x58] sm:$0xff]   ;;  %v1552_v29 = vld [vmem:[%s2407_s3 + $0x50] sm:$0xff]   ;;  %v1554_v32 = vld [vmem:[%s2407_s3 + $0x48] sm:$0xff]  }
  0x1a   :  { %143 = vperm.xlu1 %1513, %v39_v5   ;;  %v1551_v28 = vld [vmem:[%s2407_s3 + $0x18] sm:$0xff]   ;;  %v1553_v30 = vld [vmem:[%s2407_s3 + $0x10] sm:$0xff]   ;;  %v26_v33 = vld [vmem:[%s2404_s0 + $0x20] sm:$0xff] }
  0x1b   :  { %725 = vperm.xlu0 %1522, %v1681_v13   ;;  %v40_v31 = vld [vmem:[%s2404_s0 + $0x90] sm:$0xff]  ;;  %v1555_v34 = vld [vmem:[%s2407_s3 + $0x8] sm:$0xff]   ;;  %v1556_v35 = vld [vmem:[%s2407_s3 + $0x40] sm:$0xff]  }
  0x1c   :  { %1382 = vmatpush3.bf16.msra.mxu0 %v1545_v20  ;;  %1500 = vmatpush3.bf16.msra.mxu1 %v1545_v20  ;;  %v1557_v36 = vld [vmem:[%s2407_s3] sm:$0xff]   ;;  %v43_v38 = vld [vmem:[%s2404_s0 + $0xa8] sm:$0xff]  ;;  %v44_v39 = vld [vmem:[%s2404_s0 + $0xb0] sm:$0xff] }
  0x1d   :  { %1383 = vmatprep.subr.bf16.mxu0 %v1546_v21  ;;  %1493 = vmatprep.subr.bf16.mxu1 %v1546_v21  ;;  %v1787_v37 = vld [vmem:[%s2404_s0 + $0x40] sm:$0xff]  ;;  %v1807_v40 = vld [vmem:[%s2404_s0 + $0xc8] sm:$0xff]  ;;  %v1814_v41 = vld [vmem:[%s2404_s0 + $0xd0] sm:$0xff] }
  0x1e   :  { %1515 = vset.pattern.permute.xlu1 %v2412_v2  ;;  %v1820_v42 = vld [vmem:[%s2404_s0 + $0x68] sm:$0xff]  ;;  %v1827_v43 = vld [vmem:[%s2404_s0 + $0x70] sm:$0xff]  ;;  %v1833_v44 = vld [vmem:[%s2404_s0 + $0xf8] sm:$0xff] }
  0x1f   :  { %379 = vperm.xlu1 %1515, %v1666_v10   ;;  %669 = vperm.xlu0 %1522, %v1642_v6   ;;  %v46_v45 = vld [vmem:[%s2404_s0 + $0xc0] sm:$0xff]  ;;  %v1866_v51 = vld [vmem:[%s2404_s0 + $0xe8] sm:$0xff]  ;;  %v1876_v54 = vld [vmem:[%s2404_s0 + $0x78] sm:$0xff] }
  0x20   :  { %1384 = vmatpush3.bf16.msra.mxu0 %v1547_v23  ;;  %1501 = vmatpush3.bf16.msra.mxu1 %v1547_v23  ;;  %v1855_v48 = vld [vmem:[%s2404_s0 + $0x60] sm:$0xff] }
  0x21   :  { %1385 = vmatprep.subr.bf16.mxu0 %v1548_v24  ;;  %1494 = vmatprep.subr.bf16.mxu1 %v1548_v24  ;;  %v54_v16 = vld [vmem:[%s2405_s1] sm:$0x77] }
  0x23   :  { %439 = vperm.xlu1 %1515, %v1690_v14   ;;  %673 = vperm.xlu0 %1522, %v1695_v15  }
  0x24   :  { %1386 = vmatpush3.bf16.msra.mxu0 %v1549_v26  ;;  %1502 = vmatpush3.bf16.msra.mxu1 %v1549_v26 }
  0x25   :  { %1387 = vmatprep.subr.bf16.mxu0 %v1550_v27  ;;  %1495 = vmatprep.subr.bf16.mxu1 %v1550_v27 }
  0x27   :  { %1516 = vset.pattern.permute.xlu1 %v2410_v12  ;;  %741 = vperm.xlu0 %1522, %v1705_v17  }
  0x28   :  { %649 = vperm.xlu1 %1516, %v1624_v1   ;;  %1388 = vmatpush3.bf16.msra.mxu0 %v1551_v28 }
  0x29   :  { %1503 = vmatpush3.bf16.msra.mxu1 %v1551_v28  ;;  %1389 = vmatprep.subr.bf16.mxu0 %v1552_v29 }
  0x2a   :  { %1496 = vmatprep.subr.bf16.mxu1 %v1552_v29 }
  0x2b   :  { %685 = vperm.xlu0 %1522, %v1659_v9  }
  0x2c   :  { %713 = vperm.xlu1 %1516, %v1690_v14   ;;  %1390 = vmatpush3.bf16.msra.mxu0 %v1553_v30 }
  0x2d   :  { %1504 = vmatpush3.bf16.msra.mxu1 %v1553_v30  ;;  %1391 = vmatprep.subr.bf16.mxu0 %v1554_v32  ;;  %v55_v30 = vld [vmem:[%s2406_s2] sm:$0x3] }
  0x2e   :  { %1497 = vmatprep.subr.bf16.mxu1 %v1554_v32 }
  0x2f   :  { %689 = vperm.xlu0 %1522, %v1727_v22  }
  0x30   :  { %717 = vperm.xlu1 %1516, %v39_v5   ;;  %1392 = vmatpush3.bf16.msra.mxu0 %v1555_v34  ;;  %v217_v5 = vlaneseq }
  0x31   :  { %1505 = vmatpush3.bf16.msra.mxu1 %v1555_v34  ;;  %1393 = vmatprep.subr.bf16.mxu0 %v1556_v35 }
  0x32   :  { %1498 = vmatprep.subr.bf16.mxu1 %v1556_v35 }
  0x33   :  { %757 = vperm.xlu0 %1522, %v1739_v25  }
  0x34   :  { %1517 = vset.pattern.permute.xlu1 %v2414_v3  ;;  %1394 = vmatpush3.bf16.msra.mxu0 %v1557_v36 }
  0x35   :  { %153 = vperm.xlu1 %1517, %v1681_v13   ;;  %1506 = vmatpush3.bf16.msra.mxu1 %v1557_v36 }
  0x37   :  { %1533 = vset.pattern.permute.xlu0 %v2414_v3 }
  0x38   :  { %58 = vperm.xlu0 %1533, %v1624_v1  }
  0x39   :  { %1518 = vset.pattern.permute.xlu1 %v2412_v2 }
  0x3a   :  { %383 = vperm.xlu1 %1518, %v1619_v0  }
  0x3c   :  { %63 = vperm.xlu0 %1533, %v1666_v10  }
  0x3e   :  { %447 = vperm.xlu1 %1518, %v40_v31  }
  0x40   :  { %78 = vperm.xlu0 %1533, %v26_v33  }
  0x42   :  { %451 = vperm.xlu1 %1518, %v1681_v13  }
  0x44   :  { %88 = vperm.xlu0 %1533, %v1695_v15  }
  0x46   :  { %1519 = vset.pattern.permute.xlu1 %v2410_v12 }
  0x47   :  { %661 = vperm.xlu1 %1519, %v1633_v4  }
  0x48   :  { %98 = vperm.xlu0 %1533, %v1787_v37  }
  0x4b   :  { %721 = vperm.xlu1 %1519, %v40_v31  }
  0x4c   :  { %108 = vperm.xlu0 %1533, %v1727_v22  }
  0x4f   :  { %1520 = vset.pattern.permute.xlu1 %v2414_v3 }
  0x50   :  { %158 = vperm.xlu1 %1520, %v1652_v8   ;;  %138 = vperm.xlu0 %1533, %v1690_v14  }
  0x54   :  { %1521 = vset.pattern.permute.xlu1 %v2412_v2  ;;  %148 = vperm.xlu0 %1533, %v40_v31  }
  0x55   :  { %391 = vperm.xlu1 %1521, %v26_v33  }
  0x58   :  { %163 = vperm.xlu0 %1533, %v43_v38  }
  0x59   :  { %395 = vperm.xlu1 %1521, %v1642_v6  }
  0x5c   :  { %168 = vperm.xlu0 %1533, %v44_v39  }
  0x5d   :  { %459 = vperm.xlu1 %1521, %v43_v38  }
  0x60   :  { %183 = vperm.xlu0 %1533, %v1807_v40  }
  0x61   :  { %1523 = vset.pattern.permute.xlu1 %v2410_v12 }
  0x62   :  { %665 = vperm.xlu1 %1523, %v26_v33  }
  0x64   :  { %188 = vperm.xlu0 %1533, %v1814_v41  }
  0x66   :  { %729 = vperm.xlu1 %1523, %v1652_v8   ;;  %v218_v8 = vshrl.u32 %v217_v5, 7 }
  0x68   :  { %123 = vperm.xlu0 %1533, %v1820_v42   ;;  %v219_v13 = vsub.s32 0, %v218_v8  ;;  %v223_v14 = vsub.s32 4, %v218_v8  ;;  %v306_v19 = vsub.s32 1, %v218_v8  ;;  %v778_v27 = vsub.s32 2, %v218_v8 }
  0x69   :  { %v782_v28 = vsub.s32 6, %v218_v8 }
  0x6a   :  { %733 = vperm.xlu1 %1523, %v43_v38   ;;  %v220_v20 = vrot.slane %v54_v16, %v219_v13  ;;  %v224_v21 = vrot.slane %v54_v16, %v223_v14  ;;  %v505_v24 = vrot.slane %v54_v16, %v306_v19  ;;  %v779_v34 = vrot.slane %v54_v16, %v778_v27 }
  0x6b   :  { %v783_v35 = vrot.slane %v54_v16, %v782_v28  ;;  %v1952_v38 = vrot.slane %v55_v30, %v306_v19 }
  0x6c   :  { %128 = vperm.xlu0 %1533, %v1827_v43   ;;  %v1941_v31 = vrot.slane %v220_v20, %v219_v13  ;;  %v1943_v32 = vrot.slane %v224_v21, %v219_v13  ;;  %v1946_v33 = vrot.slane %v505_v24, %v306_v19 }
  0x6e   :  { %1524 = vset.pattern.permute.xlu1 %v2414_v3 }
  0x6f   :  { %173 = vperm.xlu1 %1524, %v1705_v17  }
  0x70   :  { %213 = vperm.xlu0 %1533, %v1833_v44  }
  0x73   :  { %1525 = vset.pattern.permute.xlu1 %v2412_v2 }
  0x74   :  { %399 = vperm.xlu1 %1525, %v1695_v15   ;;  %1538 = vset.pattern.permute.xlu0 %v2412_v2 }
  0x75   :  { %403 = vperm.xlu0 %1538, %v1647_v7  }
  0x78   :  { %463 = vperm.xlu1 %1525, %v44_v39  }
  0x79   :  { %471 = vperm.xlu0 %1538, %v46_v45  }
  0x7c   :  { %467 = vperm.xlu1 %1525, %v1705_v17   ;;  %v508_v17 = vsub.s32 5, %v218_v8 }
  0x7d   :  { %v1846_v46 = vpop.permute.xlu1 %68  ;;  %419 = vperm.xlu0 %1538, %v1671_v11   ;;  %v1849_v47 = vpop.permute.xlu0 %375 }
  0x7e   :  { %v509_v26 = vrot.slane %v54_v16, %v508_v17  ;;  %v1965_v17 = vrot.slane %v779_v34, %v778_v27  ;;  %v240_v21 = vmul.f32 %v1943_v32, %v1846_v46 }
  0x80   :  { %1526 = vset.pattern.permute.xlu1 %v2410_v12 }
  0x81   :  { %v1857_v49 = vpop.permute.xlu1 %73  ;;  %677 = vperm.xlu1 %1526, %v1647_v7   ;;  %v1860_v50 = vpop.permute.xlu0 %443  ;;  %423 = vperm.xlu0 %1538, %v1855_v48  }
  0x82   :  { %v242_v24 = vmul.f32 %v1943_v32, %v1857_v49 }
  0x85   :  { %v1868_v52 = vpop.permute.xlu1 %83  ;;  %737 = vperm.xlu1 %1526, %v44_v39   ;;  %v1870_v53 = vpop.permute.xlu0 %387  ;;  %491 = vperm.xlu0 %1538, %v1866_v51  }
  0x89   :  { %v1878_v55 = vpop.permute.xlu1 %93  ;;  %1527 = vset.pattern.permute.xlu1 %v2414_v3  ;;  %v1881_v56 = vpop.permute.xlu0 %455  ;;  %435 = vperm.xlu0 %1538, %v1876_v54  }
  0x8a   :  { %178 = vperm.xlu1 %1527, %v46_v45  }
  0x8d   :  { %v1884_v57 = vpop.permute.xlu1 %103  ;;  %1540 = vset.pattern.permute.xlu0 %v2410_v12 }
  0x8e   :  { %1528 = vset.pattern.permute.xlu1 %v2412_v2  ;;  %v1888_v58 = vpop.permute.xlu0 %653  ;;  %701 = vperm.xlu0 %1540, %v1820_v42  }
  0x8f   :  { %407 = vperm.xlu1 %1528, %v1787_v37  }
  0x91   :  { %v1892_v59 = vpop.permute.xlu1 %113 }
  0x92   :  { %2418 = vst [vmem:[#allocation5_spill] sm:$0xff] %v1892_v59  ;;  %v1894_v60 = vpop.permute.xlu0 %657  ;;  %705 = vperm.xlu0 %1540, %v1827_v43  }
  0x93   :  { %411 = vperm.xlu1 %1528, %v1659_v9  }
  0x95   :  { %v1898_v61 = vpop.permute.xlu1 %143 }
  0x96   :  { %v1900_v62 = vpop.permute.xlu0 %725  ;;  %773 = vperm.xlu0 %1540, %v1833_v44  }
  0x97   :  { %475 = vperm.xlu1 %1528, %v1807_v40  }
  0x9a   :  { %v1904_v63 = vpop.permute.xlu1 %379  ;;  %v1906_v0 = vpop.permute.xlu0 %669 }
  0x9b   :  { %1529 = vset.pattern.permute.xlu1 %v2410_v12 }
  0x9c   :  { %681 = vperm.xlu1 %1529, %v1787_v37   ;;  %v1950_v37 = vrot.slane %v55_v30, %v219_v13  ;;  %v239_v13 = vmul.f32 %v1941_v31, %v1846_v46 }
  0x9e   :  { %v1910_v1 = vpop.permute.xlu1 %439  ;;  %v1912_v4 = vpop.permute.xlu0 %673 }
  0xa0   :  { %745 = vperm.xlu1 %1529, %v46_v45   ;;  %v520_v45 = vmul.f32 %v1946_v33, %v1849_v47 }
  0xa2   :  { %v1914_v6 = vpop.permute.xlu0 %741 }
  0xa3   :  { %v1916_v7 = vpop.permute.xlu1 %649 }
  0xa4   :  { %749 = vperm.xlu1 %1529, %v1807_v40  }
  0xa6   :  { %v1919_v9 = vpop.permute.xlu0 %685 }
  0xa7   :  { %v1921_v10 = vpop.permute.xlu1 %713 }
  0xa8   :  { %1530 = vset.pattern.permute.xlu1 %v2414_v3 }
  0xa9   :  { %193 = vperm.xlu1 %1530, %v1739_v25  }
  0xaa   :  { %v1925_v15 = vpop.permute.xlu0 %689 }
  0xab   :  { %v1930_v18 = vpop.permute.xlu1 %717 }
  0xad   :  { %1531 = vset.pattern.permute.xlu1 %v2412_v2 }
  0xae   :  { %415 = vperm.xlu1 %1531, %v1727_v22   ;;  %v1934_v23 = vpop.permute.xlu0 %757  ;;  %v1948_v22 = vrot.slane %v509_v26, %v306_v19  ;;  %v1967_v19 = vrot.slane %v783_v35, %v778_v27  ;;  %v522_v35 = vmul.f32 %v1946_v33, %v1904_v63 }
  0xaf   :  { %2419 = vst [vmem:[#allocation6_spill] sm:$0xff] %v1934_v23 }
  0xb0   :  { %v1936_v29 = vpop.permute.xlu1 %153  ;;  %v521_v5 = vmul.f32 %v1948_v22, %v1849_v47  ;;  %v241_v47 = vmul.f32 %v1941_v31, %v1857_v49  ;;  %v797_v46 = vmul.f32 %v1967_v19, %v1888_v58  ;;  %v799_v3 = vmul.f32 %v1967_v19, %v1894_v60 }
  0xb2   :  { %479 = vperm.xlu1 %1531, %v1814_v41  }
  0xb3   :  { %v59_v36 = vpop.permute.xlu0 %58 }
  0xb4   :  { %v235_v39 = vmul.f32 %v1941_v31, %v59_v36  ;;  %v236_v40 = vmul.f32 %v1943_v32, %v59_v36 }
  0xb5   :  { %v384_v8 = vpop.permute.xlu1 %383 }
  0xb6   :  { %v310_v14 = vadd.f32 %v1950_v37, %v235_v39  ;;  %v311_v16 = vadd.f32 %v1952_v38, %v236_v40  ;;  %483 = vperm.xlu1 %1531, %v1739_v25   ;;  %v796_v25 = vmul.f32 %v1965_v17, %v1888_v58  ;;  %v525_v36 = vmul.f32 %v1948_v22, %v384_v8 }
  0xb7   :  { %v64_v20 = vpop.permute.xlu0 %63  ;;  %v523_v39 = vmul.f32 %v1948_v22, %v1904_v63  ;;  %v794_v40 = vmul.f32 %v1965_v17, %v1916_v7  ;;  %v527_v63 = vmul.f32 %v1948_v22, %v1870_v53 }
  0xb8   :  { %v237_v26 = vmul.f32 %v1941_v31, %v64_v20  ;;  %v584_v28 = vadd.f32 %v520_v45, %v310_v14  ;;  %v238_v30 = vmul.f32 %v1943_v32, %v64_v20  ;;  %v585_v34 = vadd.f32 %v521_v5, %v311_v16 }
  0xb9   :  { %v1979_v27 = vpop.permute.xlu1 %447  ;;  %v795_v45 = vmul.f32 %v1967_v19, %v1916_v7  ;;  %v315_v14 = vadd.f32 %v1952_v38, %v240_v21  ;;  %v526_v16 = vmul.f32 %v1946_v33, %v1870_v53  ;;  %v524_v21 = vmul.f32 %v1946_v33, %v384_v8 }
  0xba   :  { %v312_v49 = vadd.f32 %v1950_v37, %v237_v26  ;;  %1532 = vset.pattern.permute.xlu1 %v2410_v12  ;;  %v313_v58 = vadd.f32 %v1952_v38, %v238_v30  ;;  %v316_v26 = vadd.f32 %v1950_v37, %v241_v47  ;;  %v858_v30 = vadd.f32 %v794_v40, %v584_v28 }
  0xbb   :  { %693 = vperm.xlu1 %1532, %v1671_v11   ;;  %v1996_v5 = vpop.permute.xlu0 %78  ;;  %v859_v2 = vadd.f32 %v795_v45, %v585_v34  ;;  %v317_v11 = vadd.f32 %v1952_v38, %v242_v24  ;;  %v589_v23 = vadd.f32 %v525_v36, %v315_v14  ;;  %v314_v47 = vadd.f32 %v1950_v37, %v239_v13 }
  0xbc   :  { %v586_v20 = vadd.f32 %v522_v35, %v312_v49  ;;  %v587_v7 = vadd.f32 %v523_v39, %v313_v58  ;;  %v590_v49 = vadd.f32 %v526_v16, %v316_v26  ;;  %v922_v40 = vmax.f32 %v858_v30, 0.0 }
  0xbd   :  { %v2004_v12 = vpop.permute.xlu1 %451  ;;  %v591_v39 = vadd.f32 %v527_v63, %v317_v11  ;;  %v923_v34 = vmax.f32 %v859_v2, 0.0  ;;  %v798_v45 = vmul.f32 %v1965_v17, %v1894_v60  ;;  %v269_v8 = vmul.f32 %v1941_v31, %v1898_v61 }
  0xbe   :  { %v861_v53 = vadd.f32 %v797_v46, %v587_v7  ;;  %v860_v35 = vadd.f32 %v796_v25, %v586_v20  ;;  %v588_v36 = vadd.f32 %v524_v21, %v314_v47  ;;  %v2420_v13 = vmov 0  }
  0xbf   :  { %753 = vperm.xlu1 %1532, %v1814_v41   ;;  %v2011_v59 = vpop.permute.xlu0 %88  ;;  %v863_v41 = vadd.f32 %v799_v3, %v589_v23  ;;  %v270_v63 = vmul.f32 %v1943_v32, %v1898_v61  ;;  %v2029_v3 = vld [vmem:[%s2404_s0 + $0xe0] sm:$0xff]  ;;  %v245_v23 = vmul.f32 %v1941_v31, %v1868_v52  ;;  %v554_v61 = vmul.f32 %v1946_v33, %v1860_v50 }
  0xc0   :  { %v925_v28 = vmax.f32 %v861_v53, 0.0  ;;  %v924_v24 = vmax.f32 %v860_v35, 0.0  ;;  %v862_v26 = vadd.f32 %v798_v45, %v588_v36  ;;  %v344_v30 = vadd.f32 %v1950_v37, %v269_v8 }
  0xc1   :  { %v927_v53 = vmax.f32 %v863_v41, 0.0  ;;  %v555_v35 = vmul.f32 %v1948_v22, %v1860_v50  ;;  %v345_v47 = vadd.f32 %v1952_v38, %v270_v63  ;;  %v828_v8 = vmul.f32 %v1965_v17, %v1930_v18 }
  0xc2   :  { %v662_v58 = vpop.permute.xlu1 %661  ;;  %v987_v2 = vpack.c.bf16 %v925_v28, %v923_v34  ;;  %v986_v16 = vpack.c.bf16 %v924_v24, %v922_v40  ;;  %v246_v28 = vmul.f32 %v1943_v32, %v1868_v52  ;;  %v2049_v40 = vadd.f32 %v1950_v37, %v245_v23 }
  0xc3   :  { %v800_v46 = vmul.f32 %v1965_v17, %v662_v58  ;;  %v801_v25 = vmul.f32 %v1967_v19, %v662_v58  ;;  %1534 = vset.pattern.permute.xlu1 %v2420_v13  ;;  %v2021_v14 = vpop.permute.xlu0 %98  ;;  %v833_v24 = vmul.f32 %v1967_v19, %v1900_v62  ;;  %v926_v45 = vmax.f32 %v862_v26, 0.0 }
  0xc4   :  { %118 = vperm.xlu1 %1534, %v1855_v48   ;;  %1185 = vmatprep.mubr.bf16.mxu0 %v987_v2  ;;  %v618_v50 = vadd.f32 %v554_v61, %v344_v30  ;;  %v829_v36 = vmul.f32 %v1967_v19, %v1930_v18  ;;  %v559_v41 = vmul.f32 %v1948_v22, %v2004_v12 }
  0xc5   :  { %v864_v60 = vadd.f32 %v800_v46, %v590_v49  ;;  %v865_v20 = vadd.f32 %v801_v25, %v591_v39  ;;  %1186 = vmatmul.mubr.bf16.vlgmr.msra.gmra.mxu0 %v986_v16  ;;  %v274_v39 = vmul.f32 %v1943_v32, %v1936_v29  ;;  %v619_v16 = vadd.f32 %v555_v35, %v345_v47 }
  0xc6   :  { %v2033_v7 = vpop.permute.xlu1 %721  ;;  %v552_v63 = vmul.f32 %v1946_v33, %v1910_v1  ;;  %v553_v18 = vmul.f32 %v1948_v22, %v1910_v1  ;;  %v826_v23 = vmul.f32 %v1965_v17, %v1921_v10  ;;  %v827_v26 = vmul.f32 %v1967_v19, %v1921_v10 }
  0xc7   :  { %v929_v11 = vmax.f32 %v865_v20, 0.0  ;;  %v2038_v21 = vpop.permute.xlu0 %108  ;;  %v928_v49 = vmax.f32 %v864_v60, 0.0  ;;  %v273_v60 = vmul.f32 %v1941_v31, %v1936_v29  ;;  %v349_v20 = vadd.f32 %v1952_v38, %v274_v39 }
  0xc8   :  { %198 = vperm.xlu1 %1534, %v2029_v3   ;;  %v558_v1 = vmul.f32 %v1946_v33, %v2004_v12  ;;  %v893_v29 = vadd.f32 %v829_v36, %v619_v16  ;;  %v557_v12 = vmul.f32 %v1948_v22, %v1979_v27 }
  0xc9   :  { %v989_v34 = vpack.c.bf16 %v929_v11, %v927_v53  ;;  %v988_v2 = vpack.c.bf16 %v928_v49, %v926_v45  ;;  %v892_v11 = vadd.f32 %v828_v8, %v618_v50  ;;  %v623_v53 = vadd.f32 %v559_v41, %v349_v20 }
  0xca   :  { %v556_v50 = vmul.f32 %v1946_v33, %v1979_v27  ;;  %v831_v20 = vmul.f32 %v1967_v19, %v2033_v7 }
  0xcb   :  { %v2059_v58 = vpop.permute.xlu1 %158  ;;  %1193 = vmatprep.mubr.bf16.mxu0 %v989_v34  ;;  %v139_v52 = vpop.permute.xlu0 %138  ;;  %v2421_v34 = vmov 1  }
  0xcc   :  { %v267_v46 = vmul.f32 %v1941_v31, %v139_v52  ;;  %v268_v25 = vmul.f32 %v1943_v32, %v139_v52  ;;  %203 = vperm.xlu1 %1534, %v1866_v51   ;;  %v321_v52 = vadd.f32 %v1952_v38, %v246_v28  ;;  %v956_v28 = vmax.f32 %v892_v11, 0.0 }
  0xcd   :  { %1194 = vmatmul.mubr.bf16.gmra.mxu0 %v988_v2  ;;  %v832_v2 = vmul.f32 %v1965_v17, %v1900_v62  ;;  %v830_v11 = vmul.f32 %v1965_v17, %v2033_v7 }
  0xce   :  { %v342_v61 = vadd.f32 %v1950_v37, %v267_v46  ;;  %v343_v30 = vadd.f32 %v1952_v38, %v268_v25  ;;  %v348_v46 = vadd.f32 %v1950_v37, %v273_v60  ;;  %v897_v60 = vadd.f32 %v833_v24, %v623_v53 }
  0xcf   :  { %v149_v35 = vpop.permute.xlu0 %148 }
  0xd0   :  { %v616_v47 = vadd.f32 %v552_v63, %v342_v61  ;;  %v271_v49 = vmul.f32 %v1941_v31, %v149_v35  ;;  %v272_v39 = vmul.f32 %v1943_v32, %v149_v35  ;;  %1535 = vset.pattern.permute.xlu1 %v2421_v34  ;;  %v392_v10 = vpop.permute.xlu1 %391  ;;  %v617_v45 = vadd.f32 %v553_v18, %v343_v30 }
  0xd1   :  { %427 = vperm.xlu1 %1535, %v1820_v42   ;;  %v622_v16 = vadd.f32 %v558_v1, %v348_v46  ;;  %v957_v18 = vmax.f32 %v893_v29, 0.0  ;;  %v243_v30 = vmul.f32 %v1941_v31, %v1996_v5  ;;  %v804_v35 = vmul.f32 %v1965_v17, %v1906_v0 }
  0xd2   :  { %v346_v8 = vadd.f32 %v1950_v37, %v271_v49  ;;  %v347_v36 = vadd.f32 %v1952_v38, %v272_v39  ;;  %v891_v41 = vadd.f32 %v827_v26, %v617_v45  ;;  %v890_v25 = vadd.f32 %v826_v23, %v616_v47 }
  0xd3   :  { %v164_v63 = vpop.permute.xlu0 %163  ;;  %v244_v23 = vmul.f32 %v1943_v32, %v1996_v5  ;;  %v805_v29 = vmul.f32 %v1967_v19, %v1906_v0  ;;  %v896_v39 = vadd.f32 %v832_v2, %v622_v16 }
  0xd4   :  { %v620_v27 = vadd.f32 %v556_v50, %v346_v8  ;;  %v621_v61 = vadd.f32 %v557_v12, %v347_v36  ;;  %v396_v42 = vpop.permute.xlu1 %395  ;;  %v955_v62 = vmax.f32 %v891_v41, 0.0  ;;  %v954_v26 = vmax.f32 %v890_v25, 0.0 }
  0xd5   :  { %487 = vperm.xlu1 %1535, %v2029_v3   ;;  %v530_v24 = vmul.f32 %v1946_v33, %v396_v42  ;;  %v531_v1 = vmul.f32 %v1948_v22, %v396_v42  ;;  %v961_v50 = vmax.f32 %v897_v60, 0.0  ;;  %v318_v12 = vadd.f32 %v1950_v37, %v243_v30 }
  0xd6   :  { %v895_v53 = vadd.f32 %v831_v20, %v621_v61  ;;  %v1003_v47 = vpack.c.bf16 %v957_v18, %v955_v62  ;;  %v1002_v49 = vpack.c.bf16 %v956_v28, %v954_v26  ;;  %v894_v7 = vadd.f32 %v830_v11, %v620_v27 }
  0xd7   :  { %v2108_v5 = vpop.permute.xlu0 %168  ;;  %v319_v8 = vadd.f32 %v1952_v38, %v244_v23  ;;  %v528_v36 = vmul.f32 %v1946_v33, %v392_v10  ;;  %v529_v41 = vmul.f32 %v1948_v22, %v392_v10  ;;  %v594_v0 = vadd.f32 %v530_v24, %v2049_v40 }
  0xd8   :  { %v460_v45 = vpop.permute.xlu1 %459  ;;  %v959_v46 = vmax.f32 %v895_v53, 0.0  ;;  %1249 = vmatprep.mubr.bf16.mxu1 %v1003_v47  ;;  %v595_v25 = vadd.f32 %v531_v1, %v321_v52  ;;  %v2422_v18 = vmov 2   ;;  %v275_v28 = vmul.f32 %v1941_v31, %v2059_v58 }
  0xd9   :  { %1536 = vset.pattern.permute.xlu1 %v2422_v18  ;;  %1250 = vmatmul.mubr.bf16.vlgmr.msra.gmra.mxu1 %v1002_v49  ;;  %v276_v60 = vmul.f32 %v1943_v32, %v2059_v58  ;;  %v958_v10 = vmax.f32 %v894_v7, 0.0  ;;  %v960_v20 = vmax.f32 %v896_v39, 0.0  ;;  %v592_v27 = vadd.f32 %v528_v36, %v318_v12 }
  0xda   :  { %v1005_v2 = vpack.c.bf16 %v961_v50, %v959_v46  ;;  %697 = vperm.xlu1 %1536, %v1855_v48   ;;  %v593_v40 = vadd.f32 %v529_v41, %v319_v8  ;;  %v277_v52 = vmul.f32 %v1941_v31, %v164_v63  ;;  %v278_v61 = vmul.f32 %v1943_v32, %v164_v63 }
  0xdb   :  { %v2119_v16 = vpop.permute.xlu0 %183  ;;  %v868_v30 = vadd.f32 %v804_v35, %v594_v0  ;;  %v869_v23 = vadd.f32 %v805_v29, %v595_v25  ;;  %v560_v26 = vmul.f32 %v1946_v33, %v1881_v56  ;;  %v561_v58 = vmul.f32 %v1948_v22, %v1881_v56 }
  0xdc   :  { %1257 = vmatprep.mubr.bf16.mxu1 %v1005_v2  ;;  %v350_v11 = vadd.f32 %v1950_v37, %v275_v28  ;;  %v351_v63 = vadd.f32 %v1952_v38, %v276_v60  ;;  %v1004_v35 = vpack.c.bf16 %v960_v20, %v958_v10  ;;  %v352_v29 = vadd.f32 %v1950_v37, %v277_v52 }
  0xdd   :  { %v666_v42 = vpop.permute.xlu1 %665  ;;  %v353_v47 = vadd.f32 %v1952_v38, %v278_v61  ;;  %v562_v49 = vmul.f32 %v1946_v33, %v460_v45  ;;  %v563_v39 = vmul.f32 %v1948_v22, %v460_v45  ;;  %v932_v7 = vmax.f32 %v868_v30, 0.0  ;;  %v2152_v61 = vld [vmem:[%s2404_s0 + $0xf0] sm:$0xff] }
  0xde   :  { %v802_v62 = vmul.f32 %v1965_v17, %v666_v42  ;;  %v803_v48 = vmul.f32 %v1967_v19, %v666_v42  ;;  %761 = vperm.xlu1 %1536, %v2029_v3   ;;  %v933_v3 = vmax.f32 %v869_v23, 0.0  ;;  %v624_v36 = vadd.f32 %v560_v26, %v350_v11 }
  0xdf   :  { %v2133_v24 = vpop.permute.xlu0 %188  ;;  %v625_v41 = vadd.f32 %v561_v58, %v351_v63  ;;  %v626_v28 = vadd.f32 %v562_v49, %v352_v29  ;;  %v627_v45 = vadd.f32 %v563_v39, %v353_v47  ;;  %v247_v63 = vmul.f32 %v1941_v31, %v2011_v59 }
  0xe0   :  { %v866_v1 = vadd.f32 %v802_v62, %v592_v27  ;;  %v867_v53 = vadd.f32 %v803_v48, %v593_v40 }
  0xe1   :  { %v730_v56 = vpop.permute.xlu1 %729  ;;  %1258 = vmatmul.mubr.bf16.gmra.mxu1 %v1004_v35  ;;  %v322_v29 = vadd.f32 %v1950_v37, %v247_v63 }
  0xe2   :  { %v930_v46 = vmax.f32 %v866_v1, 0.0  ;;  %v931_v50 = vmax.f32 %v867_v53, 0.0  ;;  %v834_v12 = vmul.f32 %v1965_v17, %v730_v56  ;;  %v835_v8 = vmul.f32 %v1967_v19, %v730_v56  ;;  %765 = vperm.xlu1 %1536, %v1866_v51  }
  0xe3   :  { %v2143_v0 = vpop.permute.xlu0 %123  ;;  %v248_v1 = vmul.f32 %v1943_v32, %v2011_v59  ;;  %v249_v56 = vmul.f32 %v1941_v31, %v1878_v55  ;;  %v250_v59 = vmul.f32 %v1943_v32, %v1878_v55 }
  0xe4   :  { %v991_v25 = vpack.c.bf16 %v933_v3, %v931_v50  ;;  %v990_v2 = vpack.c.bf16 %v932_v7, %v930_v46  ;;  %v898_v10 = vadd.f32 %v834_v12, %v624_v36  ;;  %v899_v20 = vadd.f32 %v835_v8, %v625_v41 }
  0xe5   :  { %v734_v60 = vpop.permute.xlu1 %733  ;;  %v323_v47 = vadd.f32 %v1952_v38, %v248_v1  ;;  %v806_v50 = vmul.f32 %v1965_v17, %v1912_v4  ;;  %v807_v3 = vmul.f32 %v1967_v19, %v1912_v4  ;;  %v279_v7 = vmul.f32 %v1941_v31, %v2108_v5 }
  0xe6   :  { %v836_v27 = vmul.f32 %v1965_v17, %v734_v60  ;;  %v837_v40 = vmul.f32 %v1967_v19, %v734_v60  ;;  %1201 = vmatprep.mubr.bf16.mxu0 %v991_v25  ;;  %1537 = vset.pattern.permute.xlu1 %v2420_v13  ;;  %v962_v42 = vmax.f32 %v898_v10, 0.0  ;;  %v963_v30 = vmax.f32 %v899_v20, 0.0 }
  0xe7   :  { %1202 = vmatmul.mubr.bf16.gmra.mxu0 %v990_v2  ;;  %133 = vperm.xlu1 %1537, %v1876_v54   ;;  %v2154_v48 = vpop.permute.xlu0 %128  ;;  %v280_v12 = vmul.f32 %v1943_v32, %v2108_v5  ;;  %v324_v2 = vadd.f32 %v1950_v37, %v249_v56  ;;  %v840_v5 = vmul.f32 %v1965_v17, %v1914_v6 }
  0xe8   :  { %v900_v51 = vadd.f32 %v836_v27, %v626_v28  ;;  %v901_v52 = vadd.f32 %v837_v40, %v627_v45  ;;  %v325_v28 = vadd.f32 %v1952_v38, %v250_v59  ;;  %v841_v60 = vmul.f32 %v1967_v19, %v1914_v6 }
  0xe9   :  { %v354_v27 = vadd.f32 %v1950_v37, %v279_v7  ;;  %v355_v40 = vadd.f32 %v1952_v38, %v280_v12 }
  0xea   :  { %v964_v23 = vmax.f32 %v900_v51, 0.0  ;;  %v965_v62 = vmax.f32 %v901_v52, 0.0  ;;  %v174_v26 = vpop.permute.xlu1 %173 }
  0xeb   :  { %208 = vperm.xlu1 %1537, %v2152_v61   ;;  %v2161_v53 = vpop.permute.xlu0 %213 }
  0xec   :  { %v1007_v13 = vpack.c.bf16 %v965_v62, %v963_v30  ;;  %v1006_v58 = vpack.c.bf16 %v964_v23, %v962_v42 }
  0xee   :  { %1265 = vmatprep.mubr.bf16.mxu1 %v1007_v13 }
  0xef   :  { %v400_v11 = vpop.permute.xlu1 %399  ;;  %1266 = vmatmul.mubr.bf16.gmra.mxu1 %v1006_v58  ;;  %1539 = vset.pattern.permute.xlu1 %v2421_v34  ;;  %v281_v34 = vmul.f32 %v1941_v31, %v174_v26 }
  0xf0   :  { %431 = vperm.xlu1 %1539, %v1827_v43   ;;  %v532_v49 = vmul.f32 %v1946_v33, %v400_v11  ;;  %v533_v39 = vmul.f32 %v1948_v22, %v400_v11  ;;  %v282_v43 = vmul.f32 %v1943_v32, %v174_v26  ;;  %v404_v46 = vpop.permute.xlu0 %403 }
  0xf1   :  { %v534_v45 = vmul.f32 %v1946_v33, %v404_v46  ;;  %v535_v4 = vmul.f32 %v1948_v22, %v404_v46  ;;  %v356_v10 = vadd.f32 %v1950_v37, %v281_v34 }
  0xf2   :  { %v596_v8 = vadd.f32 %v532_v49, %v322_v29  ;;  %v597_v36 = vadd.f32 %v533_v39, %v323_v47  ;;  %v357_v20 = vadd.f32 %v1952_v38, %v282_v43 }
  0xf3   :  { %v464_v35 = vpop.permute.xlu1 %463  ;;  %v598_v26 = vadd.f32 %v534_v45, %v324_v2  ;;  %v599_v13 = vadd.f32 %v535_v4, %v325_v28  ;;  %v253_v28 = vmul.f32 %v1941_v31, %v1884_v57 }
  0xf4   :  { %495 = vperm.xlu1 %1539, %v2152_v61   ;;  %v564_v51 = vmul.f32 %v1946_v33, %v464_v35  ;;  %v565_v52 = vmul.f32 %v1948_v22, %v464_v35  ;;  %v870_v42 = vadd.f32 %v806_v50, %v596_v8 }
  0xf6   :  { %v628_v11 = vadd.f32 %v564_v51, %v354_v27  ;;  %v629_v63 = vadd.f32 %v565_v52, %v355_v40  ;;  %v934_v56 = vmax.f32 %v870_v42, 0.0 }
  0xf7   :  { %v468_v55 = vpop.permute.xlu1 %467 }
  0xf8   :  { %v566_v41 = vmul.f32 %v1946_v33, %v468_v55  ;;  %v567_v25 = vmul.f32 %v1948_v22, %v468_v55  ;;  %499 = vperm.xlu1 %1539, %v1833_v44   ;;  %v871_v44 = vadd.f32 %v807_v3, %v597_v36 }
  0xfa   :  { %v630_v30 = vadd.f32 %v566_v41, %v356_v10  ;;  %v631_v23 = vadd.f32 %v567_v25, %v357_v20  ;;  %v935_v39 = vmax.f32 %v871_v44, 0.0  ;;  %v252_v10 = vmul.f32 %v1943_v32, %v2021_v14 }
  0xfb   :  { %v328_v20 = vadd.f32 %v1950_v37, %v253_v28 }
  0xfc   :  { %v678_v62 = vpop.permute.xlu1 %677  ;;  %1541 = vset.pattern.permute.xlu1 %v2422_v18  ;;  %v904_v35 = vadd.f32 %v840_v5, %v630_v30  ;;  %v905_v47 = vadd.f32 %v841_v60, %v631_v23  ;;  %v251_v60 = vmul.f32 %v1941_v31, %v2021_v14  ;;  %v327_v42 = vadd.f32 %v1952_v38, %v252_v10 }
  0xfd   :  { %v808_v6 = vmul.f32 %v1965_v17, %v678_v62  ;;  %v809_v58 = vmul.f32 %v1967_v19, %v678_v62  ;;  %709 = vperm.xlu1 %1541, %v1876_v54   ;;  %v812_v23 = vmul.f32 %v1965_v17, %v1919_v9  ;;  %v813_v14 = vmul.f32 %v1967_v19, %v1919_v9 }
  0xfe   :  { %v969_v8 = vmax.f32 %v905_v47, 0.0  ;;  %v968_v36 = vmax.f32 %v904_v35, 0.0  ;;  %v285_v62 = vmul.f32 %v1941_v31, %v2119_v16 }
  0xff   :  { %v872_v1 = vadd.f32 %v808_v6, %v598_v26  ;;  %v873_v29 = vadd.f32 %v809_v58, %v599_v13  ;;  %v286_v26 = vmul.f32 %v1943_v32, %v2119_v16 }
 0x100   :  { %v738_v49 = vpop.permute.xlu1 %737 }
 0x101   :  { %v936_v59 = vmax.f32 %v872_v1, 0.0  ;;  %v937_v34 = vmax.f32 %v873_v29, 0.0  ;;  %v838_v43 = vmul.f32 %v1965_v17, %v738_v49  ;;  %v839_v18 = vmul.f32 %v1967_v19, %v738_v49  ;;  %769 = vperm.xlu1 %1541, %v2152_v61   ;;  %v472_v1 = vpop.permute.xlu0 %471 }
 0x102   :  { %v254_v61 = vmul.f32 %v1943_v32, %v1884_v57  ;;  %v326_v57 = vadd.f32 %v1950_v37, %v251_v60  ;;  %v360_v49 = vadd.f32 %v1950_v37, %v285_v62  ;;  %v568_v16 = vmul.f32 %v1946_v33, %v472_v1 }
 0x103   :  { %v902_v46 = vadd.f32 %v838_v43, %v628_v11  ;;  %v903_v50 = vadd.f32 %v839_v18, %v629_v63  ;;  %v993_v54 = vpack.c.bf16 %v937_v34, %v935_v39  ;;  %v992_v3 = vpack.c.bf16 %v936_v59, %v934_v56 }
 0x104   :  { %v329_v27 = vadd.f32 %v1952_v38, %v254_v61  ;;  %v361_v39 = vadd.f32 %v1952_v38, %v286_v26  ;;  %v569_v56 = vmul.f32 %v1948_v22, %v472_v1  ;;  %v815_v1 = vmul.f32 %v1967_v19, %v1925_v15 }
 0x105   :  { %v966_v7 = vmax.f32 %v902_v46, 0.0  ;;  %v967_v12 = vmax.f32 %v903_v50, 0.0  ;;  %v179_v55 = vpop.permute.xlu1 %178  ;;  %1209 = vmatprep.mubr.bf16.mxu0 %v993_v54 }
 0x106   :  { %1210 = vmatmul.mubr.bf16.gmra.mxu0 %v992_v3  ;;  %v283_v13 = vmul.f32 %v1941_v31, %v179_v55  ;;  %v284_v6 = vmul.f32 %v1943_v32, %v179_v55 }
 0x107   :  { %v1009_v41 = vpack.c.bf16 %v969_v8, %v967_v12  ;;  %v1008_v25 = vpack.c.bf16 %v968_v36, %v966_v7 }
 0x108   :  { %v358_v59 = vadd.f32 %v1950_v37, %v283_v13  ;;  %v359_v34 = vadd.f32 %v1952_v38, %v284_v6 }
 0x109   :  { %1273 = vmatprep.mubr.bf16.mxu1 %v1009_v41 }
 0x10a   :  { %v408_v2 = vpop.permute.xlu1 %407  ;;  %1274 = vmatmul.mubr.bf16.gmra.mxu1 %v1008_v25  ;;  %v632_v41 = vadd.f32 %v568_v16, %v358_v59  ;;  %v633_v25 = vadd.f32 %v569_v56, %v359_v34  ;;  %v2423_v56 = vld [vmem:[#allocation5_spill] sm:$0xff] }
 0x10b   :  { %v536_v44 = vmul.f32 %v1946_v33, %v408_v2  ;;  %v537_v30 = vmul.f32 %v1948_v22, %v408_v2  ;;  %v257_v59 = vmul.f32 %v1941_v31, %v2423_v56  ;;  %v258_v34 = vmul.f32 %v1943_v32, %v2423_v56 }
 0x10d   :  { %v600_v29 = vadd.f32 %v536_v44, %v326_v57  ;;  %v601_v35 = vadd.f32 %v537_v30, %v327_v42  ;;  %v255_v30 = vmul.f32 %v1941_v31, %v2038_v21 }
 0x10e   :  { %v412_v45 = vpop.permute.xlu1 %411 }
 0x10f   :  { %v538_v4 = vmul.f32 %v1946_v33, %v412_v45  ;;  %v539_v5 = vmul.f32 %v1948_v22, %v412_v45  ;;  %v330_v13 = vadd.f32 %v1950_v37, %v255_v30 }
 0x111   :  { %v602_v51 = vadd.f32 %v538_v4, %v328_v20  ;;  %v603_v52 = vadd.f32 %v539_v5, %v329_v27 }
 0x112   :  { %v476_v40 = vpop.permute.xlu1 %475 }
 0x113   :  { %v876_v58 = vadd.f32 %v812_v23, %v602_v51  ;;  %v877_v11 = vadd.f32 %v813_v14, %v603_v52  ;;  %v570_v46 = vmul.f32 %v1946_v33, %v476_v40  ;;  %v571_v50 = vmul.f32 %v1948_v22, %v476_v40 }
 0x114   :  { %v256_v23 = vmul.f32 %v1943_v32, %v2038_v21 }
 0x115   :  { %v941_v3 = vmax.f32 %v877_v11, 0.0  ;;  %v940_v7 = vmax.f32 %v876_v58, 0.0  ;;  %v634_v61 = vadd.f32 %v570_v46, %v360_v49  ;;  %v635_v45 = vadd.f32 %v571_v50, %v361_v39  ;;  %v420_v49 = vpop.permute.xlu0 %419 }
 0x116   :  { %v331_v6 = vadd.f32 %v1952_v38, %v256_v23 }
 0x117   :  { %v682_v63 = vpop.permute.xlu1 %681 }
 0x118   :  { %v810_v47 = vmul.f32 %v1965_v17, %v682_v63  ;;  %v811_v9 = vmul.f32 %v1967_v19, %v682_v63  ;;  %v814_v63 = vmul.f32 %v1965_v17, %v1925_v15  ;;  %v287_v15 = vmul.f32 %v1941_v31, %v2133_v24 }
 0x11a   :  { %v874_v43 = vadd.f32 %v810_v47, %v600_v29  ;;  %v875_v18 = vadd.f32 %v811_v9, %v601_v35 }
 0x11b   :  { %v746_v54 = vpop.permute.xlu1 %745 }
 0x11c   :  { %v938_v12 = vmax.f32 %v874_v43, 0.0  ;;  %v939_v55 = vmax.f32 %v875_v18, 0.0  ;;  %v842_v8 = vmul.f32 %v1965_v17, %v746_v54  ;;  %v843_v36 = vmul.f32 %v1967_v19, %v746_v54 }
 0x11d   :  { %v288_v18 = vmul.f32 %v1943_v32, %v2133_v24  ;;  %v542_v54 = vmul.f32 %v1946_v33, %v420_v49 }
 0x11e   :  { %v995_v2 = vpack.c.bf16 %v941_v3, %v939_v55  ;;  %v994_v28 = vpack.c.bf16 %v940_v7, %v938_v12  ;;  %v906_v5 = vadd.f32 %v842_v8, %v632_v41  ;;  %v907_v60 = vadd.f32 %v843_v36, %v633_v25 }
 0x11f   :  { %v750_v4 = vpop.permute.xlu1 %749  ;;  %v543_v3 = vmul.f32 %v1948_v22, %v420_v49  ;;  %v332_v55 = vadd.f32 %v1950_v37, %v257_v59  ;;  %v333_v8 = vadd.f32 %v1952_v38, %v258_v34  ;;  %v362_v41 = vadd.f32 %v1950_v37, %v287_v15 }
 0x120   :  { %v844_v10 = vmul.f32 %v1965_v17, %v750_v4  ;;  %v845_v20 = vmul.f32 %v1967_v19, %v750_v4  ;;  %1217 = vmatprep.mubr.bf16.mxu0 %v995_v2  ;;  %v970_v51 = vmax.f32 %v906_v5, 0.0  ;;  %v971_v52 = vmax.f32 %v907_v60, 0.0 }
 0x121   :  { %1218 = vmatmul.mubr.bf16.gmra.mxu0 %v994_v28  ;;  %v363_v25 = vadd.f32 %v1952_v38, %v288_v18  ;;  %v607_v4 = vadd.f32 %v543_v3, %v333_v8  ;;  %v261_v15 = vmul.f32 %v1941_v31, %v2143_v0  ;;  %v262_v18 = vmul.f32 %v1943_v32, %v2143_v0 }
 0x122   :  { %v908_v27 = vadd.f32 %v844_v10, %v634_v61  ;;  %v909_v40 = vadd.f32 %v845_v20, %v635_v45  ;;  %v606_v45 = vadd.f32 %v542_v54, %v332_v55  ;;  %v2424_v10 = vld [vmem:[#allocation6_spill] sm:$0xff] }
 0x123   :  { %v848_v20 = vmul.f32 %v1965_v17, %v2424_v10  ;;  %v336_v55 = vadd.f32 %v1950_v37, %v261_v15  ;;  %v337_v8 = vadd.f32 %v1952_v38, %v262_v18 }
 0x124   :  { %v972_v57 = vmax.f32 %v908_v27, 0.0  ;;  %v973_v42 = vmax.f32 %v909_v40, 0.0  ;;  %v194_v44 = vpop.permute.xlu1 %193  ;;  %v849_v27 = vmul.f32 %v1967_v19, %v2424_v10 }
 0x125   :  { %v289_v39 = vmul.f32 %v1941_v31, %v194_v44  ;;  %v290_v16 = vmul.f32 %v1943_v32, %v194_v44 }
 0x126   :  { %v1011_v14 = vpack.c.bf16 %v973_v42, %v971_v52  ;;  %v1010_v62 = vpack.c.bf16 %v972_v57, %v970_v51 }
 0x127   :  { %v364_v7 = vadd.f32 %v1950_v37, %v289_v39  ;;  %v365_v12 = vadd.f32 %v1952_v38, %v290_v16 }
 0x128   :  { %1281 = vmatprep.mubr.bf16.mxu1 %v1011_v14 }
 0x129   :  { %v416_v26 = vpop.permute.xlu1 %415  ;;  %1282 = vmatmul.mubr.bf16.gmra.mxu1 %v1010_v62 }
 0x12a   :  { %v540_v58 = vmul.f32 %v1946_v33, %v416_v26  ;;  %v541_v11 = vmul.f32 %v1948_v22, %v416_v26 }
 0x12c   :  { %v604_v21 = vadd.f32 %v540_v58, %v330_v13  ;;  %v605_v29 = vadd.f32 %v541_v11, %v331_v6 }
 0x12d   :  { %v480_v35 = vpop.permute.xlu1 %479 }
 0x12e   :  { %v878_v47 = vadd.f32 %v814_v63, %v604_v21  ;;  %v879_v9 = vadd.f32 %v815_v1, %v605_v29  ;;  %v572_v36 = vmul.f32 %v1946_v33, %v480_v35  ;;  %v573_v24 = vmul.f32 %v1948_v22, %v480_v35  ;;  %v424_v21 = vpop.permute.xlu0 %423 }
 0x130   :  { %v636_v40 = vadd.f32 %v572_v36, %v362_v41  ;;  %v637_v51 = vadd.f32 %v573_v24, %v363_v25  ;;  %v943_v23 = vmax.f32 %v879_v9, 0.0  ;;  %v942_v14 = vmax.f32 %v878_v47, 0.0 }
 0x131   :  { %v484_v43 = vpop.permute.xlu1 %483 }
 0x132   :  { %v574_v46 = vmul.f32 %v1946_v33, %v484_v43  ;;  %v575_v50 = vmul.f32 %v1948_v22, %v484_v43  ;;  %v492_v59 = vpop.permute.xlu0 %491 }
 0x134   :  { %v638_v2 = vadd.f32 %v574_v46, %v364_v7  ;;  %v639_v28 = vadd.f32 %v575_v50, %v365_v12 }
 0x136   :  { %v694_v61 = vpop.permute.xlu1 %693  ;;  %v912_v42 = vadd.f32 %v848_v20, %v638_v2  ;;  %v913_v44 = vadd.f32 %v849_v27, %v639_v28  ;;  %v2290_v43 = vpop.permute.xlu0 %435 }
 0x137   :  { %v816_v5 = vmul.f32 %v1965_v17, %v694_v61  ;;  %v817_v60 = vmul.f32 %v1967_v19, %v694_v61  ;;  %v544_v61 = vmul.f32 %v1946_v33, %v424_v21 }
 0x138   :  { %v977_v39 = vmax.f32 %v913_v44, 0.0  ;;  %v976_v16 = vmax.f32 %v912_v42, 0.0 }
 0x139   :  { %v880_v52 = vadd.f32 %v816_v5, %v606_v45  ;;  %v881_v57 = vadd.f32 %v817_v60, %v607_v4  ;;  %v545_v45 = vmul.f32 %v1948_v22, %v424_v21 }
 0x13a   :  { %v754_v30 = vpop.permute.xlu1 %753  ;;  %v702_v12 = vpop.permute.xlu0 %701 }
 0x13b   :  { %v944_v62 = vmax.f32 %v880_v52, 0.0  ;;  %v945_v26 = vmax.f32 %v881_v57, 0.0  ;;  %v846_v13 = vmul.f32 %v1965_v17, %v754_v30  ;;  %v847_v6 = vmul.f32 %v1967_v19, %v754_v30 }
 0x13c   :  { %v820_v25 = vmul.f32 %v1965_v17, %v702_v12  ;;  %v821_v0 = vmul.f32 %v1967_v19, %v702_v12 }
 0x13d   :  { %v910_v58 = vadd.f32 %v846_v13, %v636_v40  ;;  %v911_v11 = vadd.f32 %v847_v6, %v637_v51  ;;  %v997_v63 = vpack.c.bf16 %v945_v26, %v943_v23  ;;  %v996_v1 = vpack.c.bf16 %v944_v62, %v942_v14 }
 0x13e   :  { %v578_v23 = vmul.f32 %v1946_v33, %v492_v59  ;;  %v579_v14 = vmul.f32 %v1948_v22, %v492_v59 }
 0x13f   :  { %v974_v29 = vmax.f32 %v910_v58, 0.0  ;;  %v975_v35 = vmax.f32 %v911_v11, 0.0  ;;  %v119_v49 = vpop.permute.xlu1 %118  ;;  %1225 = vmatprep.mubr.bf16.mxu0 %v997_v63 }
 0x140   :  { %1226 = vmatmul.mubr.bf16.gmra.mxu0 %v996_v1  ;;  %v259_v3 = vmul.f32 %v1941_v31, %v119_v49  ;;  %v260_v7 = vmul.f32 %v1943_v32, %v119_v49 }
 0x141   :  { %v1013_v9 = vpack.c.bf16 %v977_v39, %v975_v35  ;;  %v1012_v47 = vpack.c.bf16 %v976_v16, %v974_v29 }
 0x142   :  { %v334_v2 = vadd.f32 %v1950_v37, %v259_v3  ;;  %v335_v28 = vadd.f32 %v1952_v38, %v260_v7 }
 0x143   :  { %v199_v56 = vpop.permute.xlu1 %198  ;;  %1289 = vmatprep.mubr.bf16.mxu1 %v1013_v9 }
 0x144   :  { %1290 = vmatmul.mubr.bf16.gmra.mxu1 %v1012_v47  ;;  %v291_v4 = vmul.f32 %v1941_v31, %v199_v56  ;;  %v292_v5 = vmul.f32 %v1943_v32, %v199_v56  ;;  %v608_v51 = vadd.f32 %v544_v61, %v334_v2  ;;  %v609_v52 = vadd.f32 %v545_v45, %v335_v28 }
 0x145   :  { %v263_v28 = vmul.f32 %v1941_v31, %v2154_v48  ;;  %v264_v61 = vmul.f32 %v1943_v32, %v2154_v48 }
 0x146   :  { %v366_v44 = vadd.f32 %v1950_v37, %v291_v4  ;;  %v367_v30 = vadd.f32 %v1952_v38, %v292_v5 }
 0x147   :  { %v204_v34 = vpop.permute.xlu1 %203 }
 0x148   :  { %v293_v60 = vmul.f32 %v1941_v31, %v204_v34  ;;  %v294_v10 = vmul.f32 %v1943_v32, %v204_v34 }
 0x14a   :  { %v368_v58 = vadd.f32 %v1950_v37, %v293_v60  ;;  %v369_v11 = vadd.f32 %v1952_v38, %v294_v10  ;;  %v338_v60 = vadd.f32 %v1950_v37, %v263_v28  ;;  %v339_v10 = vadd.f32 %v1952_v38, %v264_v61 }
 0x14c   :  { %v428_v46 = vpop.permute.xlu1 %427  ;;  %v642_v34 = vadd.f32 %v578_v23, %v368_v58  ;;  %v643_v15 = vadd.f32 %v579_v14, %v369_v11  ;;  %v550_v58 = vmul.f32 %v1946_v33, %v2290_v43  ;;  %v551_v11 = vmul.f32 %v1948_v22, %v2290_v43 }
 0x14d   :  { %v546_v50 = vmul.f32 %v1946_v33, %v428_v46  ;;  %v547_v54 = vmul.f32 %v1948_v22, %v428_v46 }
 0x14f   :  { %v610_v24 = vadd.f32 %v546_v50, %v336_v55  ;;  %v611_v41 = vadd.f32 %v547_v54, %v337_v8 }
 0x150   :  { %v488_v36 = vpop.permute.xlu1 %487 }
 0x151   :  { %v884_v20 = vadd.f32 %v820_v25, %v610_v24  ;;  %v885_v27 = vadd.f32 %v821_v0, %v611_v41  ;;  %v576_v62 = vmul.f32 %v1946_v33, %v488_v36  ;;  %v577_v26 = vmul.f32 %v1948_v22, %v488_v36 }
 0x153   :  { %v948_v63 = vmax.f32 %v884_v20, 0.0  ;;  %v949_v1 = vmax.f32 %v885_v27, 0.0  ;;  %v640_v16 = vadd.f32 %v576_v62, %v366_v44  ;;  %v641_v9 = vadd.f32 %v577_v26, %v367_v30  ;;  %v706_v20 = vpop.permute.xlu0 %705 }
 0x154   :  { %v297_v27 = vmul.f32 %v1941_v31, %v2161_v53  ;;  %v823_v44 = vmul.f32 %v1967_v19, %v706_v20 }
 0x155   :  { %v698_v40 = vpop.permute.xlu1 %697 }
 0x156   :  { %v818_v57 = vmul.f32 %v1965_v17, %v698_v40  ;;  %v819_v42 = vmul.f32 %v1967_v19, %v698_v40  ;;  %v298_v40 = vmul.f32 %v1943_v32, %v2161_v53  ;;  %v372_v26 = vadd.f32 %v1950_v37, %v297_v27 }
 0x157   :  { %v774_v62 = vpop.permute.xlu0 %773 }
 0x158   :  { %v882_v13 = vadd.f32 %v818_v57, %v608_v51  ;;  %v883_v6 = vadd.f32 %v819_v42, %v609_v52  ;;  %v822_v42 = vmul.f32 %v1965_v17, %v706_v20  ;;  %v373_v53 = vadd.f32 %v1952_v38, %v298_v40 }
 0x159   :  { %v762_v21 = vpop.permute.xlu1 %761 }
 0x15a   :  { %v946_v29 = vmax.f32 %v882_v13, 0.0  ;;  %v947_v35 = vmax.f32 %v883_v6, 0.0  ;;  %v850_v49 = vmul.f32 %v1965_v17, %v762_v21  ;;  %v851_v39 = vmul.f32 %v1967_v19, %v762_v21 }
 0x15c   :  { %v999_v47 = vpack.c.bf16 %v949_v1, %v947_v35  ;;  %v998_v56 = vpack.c.bf16 %v948_v63, %v946_v29  ;;  %v914_v18 = vadd.f32 %v850_v49, %v640_v16  ;;  %v915_v46 = vadd.f32 %v851_v39, %v641_v9 }
 0x15d   :  { %v766_v59 = vpop.permute.xlu1 %765  ;;  %v856_v35 = vmul.f32 %v1965_v17, %v774_v62  ;;  %v857_v49 = vmul.f32 %v1967_v19, %v774_v62 }
 0x15e   :  { %v852_v50 = vmul.f32 %v1965_v17, %v766_v59  ;;  %v853_v54 = vmul.f32 %v1967_v19, %v766_v59  ;;  %1233 = vmatprep.mubr.bf16.mxu0 %v999_v47  ;;  %v978_v12 = vmax.f32 %v914_v18, 0.0  ;;  %v979_v55 = vmax.f32 %v915_v46, 0.0 }
 0x15f   :  { %1234 = vmatmul.mubr.bf16.gmra.mxu0 %v998_v56 }
 0x160   :  { %v916_v3 = vadd.f32 %v852_v50, %v642_v34  ;;  %v917_v7 = vadd.f32 %v853_v54, %v643_v15 }
 0x162   :  { %v980_v8 = vmax.f32 %v916_v3, 0.0  ;;  %v981_v36 = vmax.f32 %v917_v7, 0.0  ;;  %v134_v24 = vpop.permute.xlu1 %133 }
 0x163   :  { %v265_v51 = vmul.f32 %v1941_v31, %v134_v24  ;;  %v266_v48 = vmul.f32 %v1943_v32, %v134_v24 }
 0x164   :  { %v1015_v41 = vpack.c.bf16 %v981_v36, %v979_v55  ;;  %v1014_v25 = vpack.c.bf16 %v980_v8, %v978_v12 }
 0x165   :  { %v340_v13 = vadd.f32 %v1950_v37, %v265_v51  ;;  %v341_v6 = vadd.f32 %v1952_v38, %v266_v48 }
 0x166   :  { %v209_v0 = vpop.permute.xlu1 %208  ;;  %1297 = vmatprep.mubr.bf16.mxu1 %v1015_v41 }
 0x167   :  { %1298 = vmatmul.mubr.bf16.gmra.mxu1 %v1014_v25  ;;  %v295_v63 = vmul.f32 %v1941_v31, %v209_v0  ;;  %v296_v1 = vmul.f32 %v1943_v32, %v209_v0  ;;  %v614_v59 = vadd.f32 %v550_v58, %v340_v13  ;;  %v615_v34 = vadd.f32 %v551_v11, %v341_v6 }
 0x169   :  { %v370_v32 = vadd.f32 %v1950_v37, %v295_v63  ;;  %v371_v15 = vadd.f32 %v1952_v38, %v296_v1 }
 0x16b   :  { %v432_v2 = vpop.permute.xlu1 %431 }
 0x16c   :  { %v548_v45 = vmul.f32 %v1946_v33, %v432_v2  ;;  %v549_v4 = vmul.f32 %v1948_v22, %v432_v2 }
 0x16e   :  { %v612_v52 = vadd.f32 %v548_v45, %v338_v60  ;;  %v613_v57 = vadd.f32 %v549_v4, %v339_v10 }
 0x16f   :  { %v496_v5 = vpop.permute.xlu1 %495 }
 0x170   :  { %v886_v21 = vadd.f32 %v822_v42, %v612_v52  ;;  %v887_v29 = vadd.f32 %v823_v44, %v613_v57  ;;  %v580_v39 = vmul.f32 %v1946_v33, %v496_v5  ;;  %v581_v16 = vmul.f32 %v1948_v22, %v496_v5 }
 0x172   :  { %v950_v18 = vmax.f32 %v886_v21, 0.0  ;;  %v951_v46 = vmax.f32 %v887_v29, 0.0  ;;  %v645_v3 = vadd.f32 %v581_v16, %v371_v15 }
 0x173   :  { %v500_v30 = vpop.permute.xlu1 %499 }
 0x174   :  { %v582_v23 = vmul.f32 %v1946_v33, %v500_v30  ;;  %v583_v14 = vmul.f32 %v1948_v22, %v500_v30  ;;  %v644_v33 = vadd.f32 %v580_v39, %v370_v32 }
 0x176   :  { %v646_v9 = vadd.f32 %v582_v23, %v372_v26  ;;  %v647_v47 = vadd.f32 %v583_v14, %v373_v53 }
 0x178   :  { %v710_v56 = vpop.permute.xlu1 %709  ;;  %v920_v22 = vadd.f32 %v856_v35, %v646_v9  ;;  %v921_v7 = vadd.f32 %v857_v49, %v647_v47 }
 0x179   :  { %v824_v43 = vmul.f32 %v1965_v17, %v710_v56  ;;  %v825_v31 = vmul.f32 %v1967_v19, %v710_v56 }
 0x17a   :  { %v984_v38 = vmax.f32 %v920_v22, 0.0  ;;  %v985_v2 = vmax.f32 %v921_v7, 0.0 }
 0x17b   :  { %v888_v50 = vadd.f32 %v824_v43, %v614_v59  ;;  %v889_v54 = vadd.f32 %v825_v31, %v615_v34 }
 0x17c   :  { %v770_v12 = vpop.permute.xlu1 %769 }
 0x17d   :  { %v952_v55 = vmax.f32 %v888_v50, 0.0  ;;  %v953_v8 = vmax.f32 %v889_v54, 0.0  ;;  %v854_v36 = vmul.f32 %v1965_v17, %v770_v12  ;;  %v855_v24 = vmul.f32 %v1967_v19, %v770_v12  ;;  %v2367_v17 = vld [vmem:[%s2408_s4] ss:$0 sm:$0xff]  ;;  %s1583_s4 = smov [#allocation2]  }
 0x17e   :  { %s1351_s15 = sshll.u32 %s1583_s4, 4  ;;  %s1352_s15 = int_to_ptr.vmem [resolvable:$true] %s1351_s15 }
 0x17f   :  { %v918_v41 = vadd.f32 %v854_v36, %v644_v33  ;;  %v919_v25 = vadd.f32 %v855_v24, %v645_v3  ;;  %v1001_v37 = vpack.c.bf16 %v953_v8, %v951_v46  ;;  %v1000_v0 = vpack.c.bf16 %v952_v55, %v950_v18  ;;  %s1558_s16 = scalar_lea.vmem %s1352_s15, 4096  ;;  %p1563_p1 = scmp.lt.s32.totalorder %s1352_s15, %s1352_s15 }
 0x180   :  { %p1559_p0 = scmp.ne.s32.totalorder %s1352_s15, %s1558_s16  ;;  %p1564_p2 = scmp.lt.s32.totalorder %s1558_s16, %s1558_s16 }
 0x181   :  { %v982_v28 = vmax.f32 %v918_v41, 0.0  ;;  %v983_v61 = vmax.f32 %v919_v25, 0.0  ;;  %1241 = vmatprep.mubr.bf16.mxu0 %v1001_v37 }
 0x182   :  { %1242 = vmatmul.mubr.bf16.gmra.mxu0 %v1000_v0  ;;  %p1565_p3 = por %p1564_p2, %p1563_p1 }
 0x183   :  { %v1017_v45 = vpack.c.bf16 %v985_v2, %v983_v61  ;;  %v1016_v4 = vpack.c.bf16 %v984_v38, %v982_v28 }
 0x184   :  { %p1566_p4 = pnand %p1565_p3, %p1559_p0 }
 0x185   :  { %v1395_v5 = vpop.f32.mrf.mxu0  ;;  %1305 = vmatprep.mubr.bf16.mxu1 %v1017_v45 }
 0x186   :  { %1306 = vmatmul.mubr.bf16.gmra.mxu1 %v1016_v4 }
 0x187   :  { %v1396_v19 = vpop.f32.mrf.mxu0 }
 0x188   :  { %v1397_v60 = vadd.f32 %v1396_v19, %v1395_v5 }
 0x189   :  { %v1398_v10 = vpop.f32.mrf.mxu0 }
 0x18a   :  { %v1188_v20 = vadd.f32 %v1397_v60, %v2367_v17 }
 0x18b   :  { %v1399_v27 = vpop.f32.mrf.mxu0 }
 0x18c   :  { %1314 = vst [vmem:[#allocation2] sm:$0xff] %v1188_v20  ;;  %v1400_v40 = vadd.f32 %v1399_v27, %v1398_v10 }
 0x18d   :  { %v1401_v51 = vpop.f32.mrf.mxu0 }
 0x18e   :  { %v1191_v48 = vadd.f32 %v1400_v40, %v2367_v17 }
 0x18f   :  { %v1402_v52 = vpop.f32.mrf.mxu0 }
 0x190   :  { %1315 = vst [vmem:[#allocation2 + $0x8] sm:$0xff] %v1191_v48  ;;  %v1403_v57 = vadd.f32 %v1402_v52, %v1401_v51 }
 0x191   :  { %v1404_v42 = vpop.f32.mrf.mxu0 }
 0x192   :  { %v1196_v44 = vadd.f32 %v1403_v57, %v2367_v17 }
 0x193   :  { %v1405_v30 = vpop.f32.mrf.mxu0 }
 0x194   :  { %1316 = vst [vmem:[#allocation2 + $0x10] sm:$0xff] %v1196_v44  ;;  %v1406_v23 = vadd.f32 %v1405_v30, %v1404_v42 }
 0x196   :  { %v1199_v14 = vadd.f32 %v1406_v23, %v2367_v17 }
 0x198   :  { %1317 = vst [vmem:[#allocation2 + $0x18] sm:$0xff] %v1199_v14 }
 0x199   :  { %v1443_v62 = vpop.f32.mrf.mxu1 }
 0x19b   :  { %v1444_v26 = vpop.f32.mrf.mxu1 }
 0x19c   :  { %v1445_v53 = vadd.f32 %v1444_v26, %v1443_v62 }
 0x19d   :  { %v1446_v13 = vpop.f32.mrf.mxu1 }
 0x19e   :  { %v1252_v6 = vadd.f32 %v1445_v53, %v2367_v17 }
 0x19f   :  { %v1447_v58 = vpop.f32.mrf.mxu1 }
 0x1a0   :  { %1330 = vst [vmem:[#allocation2 + $0x80] sm:$0xff] %v1252_v6  ;;  %v1448_v11 = vadd.f32 %v1447_v58, %v1446_v13 }
 0x1a1   :  { %v1449_v63 = vpop.f32.mrf.mxu1 }
 0x1a2   :  { %v1255_v1 = vadd.f32 %v1448_v11, %v2367_v17 }
 0x1a3   :  { %v1450_v21 = vpop.f32.mrf.mxu1 }
 0x1a4   :  { %1331 = vst [vmem:[#allocation2 + $0x88] sm:$0xff] %v1255_v1  ;;  %v1451_v29 = vadd.f32 %v1450_v21, %v1449_v63 }
 0x1a5   :  { %v1452_v35 = vpop.f32.mrf.mxu1 }
 0x1a6   :  { %v1260_v49 = vadd.f32 %v1451_v29, %v2367_v17 }
 0x1a7   :  { %v1407_v39 = vpop.f32.mrf.mxu0  ;;  %v1453_v16 = vpop.f32.mrf.mxu1 }
 0x1a8   :  { %1332 = vst [vmem:[#allocation2 + $0x90] sm:$0xff] %v1260_v49  ;;  %v1454_v9 = vadd.f32 %v1453_v16, %v1452_v35 }
 0x1a9   :  { %v1408_v47 = vpop.f32.mrf.mxu0 }
 0x1aa   :  { %v1409_v56 = vadd.f32 %v1408_v47, %v1407_v39  ;;  %v1263_v59 = vadd.f32 %v1454_v9, %v2367_v17 }
 0x1ab   :  { %v1410_v34 = vpop.f32.mrf.mxu0 }
 0x1ac   :  { %v1204_v43 = vadd.f32 %v1409_v56, %v2367_v17  ;;  %1333 = vst [vmem:[#allocation2 + $0x98] sm:$0xff] %v1263_v59 }
 0x1ad   :  { %v1411_v31 = vpop.f32.mrf.mxu0 }
 0x1ae   :  { %1318 = vst [vmem:[#allocation2 + $0x20] sm:$0xff] %v1204_v43  ;;  %v1412_v32 = vadd.f32 %v1411_v31, %v1410_v34 }
 0x1af   :  { %v1455_v15 = vpop.f32.mrf.mxu1 }
 0x1b0   :  { %v1207_v18 = vadd.f32 %v1412_v32, %v2367_v17 }
 0x1b1   :  { %v1456_v46 = vpop.f32.mrf.mxu1 }
 0x1b2   :  { %1319 = vst [vmem:[#allocation2 + $0x28] sm:$0xff] %v1207_v18  ;;  %v1457_v50 = vadd.f32 %v1456_v46, %v1455_v15 }
 0x1b3   :  { %v1458_v54 = vpop.f32.mrf.mxu1 }
 0x1b4   :  { %v1268_v33 = vadd.f32 %v1457_v50, %v2367_v17 }
 0x1b5   :  { %v1459_v3 = vpop.f32.mrf.mxu1 }
 0x1b6   :  { %1334 = vst [vmem:[#allocation2 + $0xa0] sm:$0xff] %v1268_v33  ;;  %v1460_v22 = vadd.f32 %v1459_v3, %v1458_v54 }
 0x1b8   :  { %v1271_v7 = vadd.f32 %v1460_v22, %v2367_v17 }
 0x1ba   :  { %1335 = vst [vmem:[#allocation2 + $0xa8] sm:$0xff] %v1271_v7 }
 0x1c6   :  { %v1413_v12 = vpop.f32.mrf.mxu0 }
 0x1c8   :  { %v1414_v55 = vpop.f32.mrf.mxu0 }
 0x1c9   :  { %v1415_v8 = vadd.f32 %v1414_v55, %v1413_v12 }
 0x1ca   :  { %v1416_v36 = vpop.f32.mrf.mxu0  ;;  %v1461_v24 = vpop.f32.mrf.mxu1 }
 0x1cb   :  { %v1212_v41 = vadd.f32 %v1415_v8, %v2367_v17 }
 0x1cc   :  { %v1417_v25 = vpop.f32.mrf.mxu0  ;;  %v1462_v37 = vpop.f32.mrf.mxu1 }
 0x1cd   :  { %1320 = vst [vmem:[#allocation2 + $0x30] sm:$0xff] %v1212_v41  ;;  %v1418_v0 = vadd.f32 %v1417_v25, %v1416_v36  ;;  %v1463_v38 = vadd.f32 %v1462_v37, %v1461_v24 }
 0x1ce   :  { %v1464_v2 = vpop.f32.mrf.mxu1 }
 0x1cf   :  { %v1215_v28 = vadd.f32 %v1418_v0, %v2367_v17  ;;  %v1276_v61 = vadd.f32 %v1463_v38, %v2367_v17 }
 0x1d0   :  { %v1465_v45 = vpop.f32.mrf.mxu1 }
 0x1d1   :  { %1321 = vst [vmem:[#allocation2 + $0x38] sm:$0xff] %v1215_v28  ;;  %1336 = vst [vmem:[#allocation2 + $0xb0] sm:$0xff] %v1276_v61  ;;  %v1466_v4 = vadd.f32 %v1465_v45, %v1464_v2 }
 0x1d3   :  { %v1279_v5 = vadd.f32 %v1466_v4, %v2367_v17 }
 0x1d5   :  { %1337 = vst [vmem:[#allocation2 + $0xb8] sm:$0xff] %v1279_v5 }
 0x1e1   :  { %v1419_v19 = vpop.f32.mrf.mxu0 }
 0x1e3   :  { %v1420_v60 = vpop.f32.mrf.mxu0 }
 0x1e4   :  { %v1421_v10 = vadd.f32 %v1420_v60, %v1419_v19 }
 0x1e5   :  { %v1422_v20 = vpop.f32.mrf.mxu0 }
 0x1e6   :  { %v1220_v27 = vadd.f32 %v1421_v10, %v2367_v17 }
 0x1e7   :  { %v1423_v40 = vpop.f32.mrf.mxu0 }
 0x1e8   :  { %1322 = vst [vmem:[#allocation2 + $0x40] sm:$0xff] %v1220_v27  ;;  %v1424_v51 = vadd.f32 %v1423_v40, %v1422_v20 }
 0x1e9   :  { %v1467_v48 = vpop.f32.mrf.mxu1 }
 0x1ea   :  { %v1223_v52 = vadd.f32 %v1424_v51, %v2367_v17 }
 0x1eb   :  { %v1468_v57 = vpop.f32.mrf.mxu1 }
 0x1ec   :  { %1323 = vst [vmem:[#allocation2 + $0x48] sm:$0xff] %v1223_v52  ;;  %v1469_v42 = vadd.f32 %v1468_v57, %v1467_v48 }
 0x1ed   :  { %v1470_v44 = vpop.f32.mrf.mxu1 }
 0x1ee   :  { %v1284_v30 = vadd.f32 %v1469_v42, %v2367_v17 }
 0x1ef   :  { %v1471_v23 = vpop.f32.mrf.mxu1 }
 0x1f0   :  { %1338 = vst [vmem:[#allocation2 + $0xc0] sm:$0xff] %v1284_v30  ;;  %v1472_v14 = vadd.f32 %v1471_v23, %v1470_v44 }
 0x1f2   :  { %v1287_v62 = vadd.f32 %v1472_v14, %v2367_v17 }
 0x1f4   :  { %1339 = vst [vmem:[#allocation2 + $0xc8] sm:$0xff] %v1287_v62 }
 0x200   :  { %v1425_v26 = vpop.f32.mrf.mxu0 }
 0x202   :  { %v1426_v53 = vpop.f32.mrf.mxu0 }
 0x203   :  { %v1427_v13 = vadd.f32 %v1426_v53, %v1425_v26 }
 0x204   :  { %v1428_v6 = vpop.f32.mrf.mxu0  ;;  %v1473_v58 = vpop.f32.mrf.mxu1 }
 0x205   :  { %v1228_v11 = vadd.f32 %v1427_v13, %v2367_v17 }
 0x206   :  { %v1429_v63 = vpop.f32.mrf.mxu0  ;;  %v1474_v1 = vpop.f32.mrf.mxu1 }
 0x207   :  { %1324 = vst [vmem:[#allocation2 + $0x50] sm:$0xff] %v1228_v11  ;;  %v1430_v21 = vadd.f32 %v1429_v63, %v1428_v6  ;;  %v1475_v29 = vadd.f32 %v1474_v1, %v1473_v58 }
 0x208   :  { %v1476_v35 = vpop.f32.mrf.mxu1 }
 0x209   :  { %v1231_v49 = vadd.f32 %v1430_v21, %v2367_v17  ;;  %v1292_v39 = vadd.f32 %v1475_v29, %v2367_v17 }
 0x20a   :  { %v1477_v16 = vpop.f32.mrf.mxu1 }
 0x20b   :  { %1325 = vst [vmem:[#allocation2 + $0x58] sm:$0xff] %v1231_v49  ;;  %1340 = vst [vmem:[#allocation2 + $0xd0] sm:$0xff] %v1292_v39  ;;  %v1478_v9 = vadd.f32 %v1477_v16, %v1476_v35 }
 0x20d   :  { %v1295_v47 = vadd.f32 %v1478_v9, %v2367_v17 }
 0x20f   :  { %1341 = vst [vmem:[#allocation2 + $0xd8] sm:$0xff] %v1295_v47 }
 0x21f   :  { %v1431_v56 = vpop.f32.mrf.mxu0 }
 0x221   :  { %v1432_v59 = vpop.f32.mrf.mxu0 }
 0x222   :  { %v1433_v34 = vadd.f32 %v1432_v59, %v1431_v56 }
 0x223   :  { %v1434_v43 = vpop.f32.mrf.mxu0 }
 0x224   :  { %v1236_v31 = vadd.f32 %v1433_v34, %v2367_v17 }
 0x225   :  { %v1435_v32 = vpop.f32.mrf.mxu0 }
 0x226   :  { %1326 = vst [vmem:[#allocation2 + $0x60] sm:$0xff] %v1236_v31  ;;  %v1436_v15 = vadd.f32 %v1435_v32, %v1434_v43 }
 0x227   :  { %v1479_v18 = vpop.f32.mrf.mxu1 }
 0x228   :  { %v1239_v46 = vadd.f32 %v1436_v15, %v2367_v17 }
 0x229   :  { %v1480_v50 = vpop.f32.mrf.mxu1 }
 0x22a   :  { %1327 = vst [vmem:[#allocation2 + $0x68] sm:$0xff] %v1239_v46  ;;  %v1481_v54 = vadd.f32 %v1480_v50, %v1479_v18 }
 0x22b   :  { %v1482_v33 = vpop.f32.mrf.mxu1 }
 0x22c   :  { %v1300_v3 = vadd.f32 %v1481_v54, %v2367_v17 }
 0x22d   :  { %v1483_v22 = vpop.f32.mrf.mxu1 }
 0x22e   :  { %1342 = vst [vmem:[#allocation2 + $0xe0] sm:$0xff] %v1300_v3  ;;  %v1484_v7 = vadd.f32 %v1483_v22, %v1482_v33 }
 0x230   :  { %v1303_v12 = vadd.f32 %v1484_v7, %v2367_v17 }
 0x232   :  { %1343 = vst [vmem:[#allocation2 + $0xe8] sm:$0xff] %v1303_v12 }
 0x242   :  { %v1437_v55 = vpop.f32.mrf.mxu0 }
 0x244   :  { %v1438_v8 = vpop.f32.mrf.mxu0 }
 0x245   :  { %v1439_v36 = vadd.f32 %v1438_v8, %v1437_v55 }
 0x246   :  { %v1440_v24 = vpop.f32.mrf.mxu0  ;;  %v1485_v41 = vpop.f32.mrf.mxu1 }
 0x247   :  { %v1244_v25 = vadd.f32 %v1439_v36, %v2367_v17 }
 0x248   :  { %v1441_v37 = vpop.f32.mrf.mxu0  ;;  %v1486_v0 = vpop.f32.mrf.mxu1 }
 0x249   :  { %1328 = vst [vmem:[#allocation2 + $0x70] sm:$0xff] %v1244_v25  ;;  %v1442_v38 = vadd.f32 %v1441_v37, %v1440_v24  ;;  %v1487_v2 = vadd.f32 %v1486_v0, %v1485_v41 }
 0x24a   :  { %v1488_v28 = vpop.f32.mrf.mxu1 }
 0x24b   :  { %v1247_v61 = vadd.f32 %v1442_v38, %v2367_v17  ;;  %v1308_v45 = vadd.f32 %v1487_v2, %v2367_v17 }
 0x24c   :  { %v1489_v4 = vpop.f32.mrf.mxu1 }
 0x24d   :  { %1329 = vst [vmem:[#allocation2 + $0x78] sm:$0xff] %v1247_v61  ;;  %1344 = vst [vmem:[#allocation2 + $0xf0] sm:$0xff] %v1308_v45  ;;  %v1490_v5 = vadd.f32 %v1489_v4, %v1488_v28 }
 0x24f   :  { %v1311_v19 = vadd.f32 %v1490_v5, %v2367_v17 }
 0x251   :  { %1345 = vst [vmem:[#allocation2 + $0xf8] sm:$0xff] %v1311_v19 }
 0x252   :  { %1569 = shalt.err (!%p1566_p4)
}
 0x253   :  { %s1584_s17 = smov 128   ;;  %s1585_s18 = smov 8  }
 0x254   :  { %1357 = dma.vmem_to_hbm [thread:$0]  %s1352_s15, 4096, %s2409_s5, [#allocation3], %s1584_s17, %s1584_s17, %s1585_s18  }
 0x255   :  { %1578 = dma.done.wait [#allocation3], 4096  }
 0x256   :  { %1579 = vsyncadd [#allocation3], 4294963200 }
 0x257   :  { %1361 = vsyncpa [#allocation3], 1 }

</bundles_post_ra>
